<compile_context>
chip_gen: v7x
topology: tpu7x:2x2x1
jax: 0.10.0
libtpu: 0.0.40
codegen_flags: <defaults>
</compile_context>

<pallas_src>
import jax
import jax.numpy as jnp
import numpy as np
from jax.experimental import pallas as pl
from jax.experimental.pallas import tpu as pltpu


def _make_relgan_d_kernel(B, S, E, FD, MAXF, KB, KBLK):
    def kernel(inp_ref, embw_ref, convw_ref, convb_ref, nt_ref,
               hww_ref, hwb_ref, f2ow_ref, f2ob_ref, o2lw_ref, o2lb_ref,
               out_ref,
               pred0_chunks, pred0_full, hwacc):
        k = pl.program_id(0)

        # ---- step 0: embeddings + fused conv + masked max-pool -> pred0 --------
        @pl.when(k == 0)
        def _():
            inp = inp_ref[...]                                        # (B*S, V) f32
            emb = jnp.dot(inp, embw_ref[...],
                          preferred_element_type=jnp.float32)         # (B*S, E)

            # im2col over the sequence axis: column block dt holds emb shifted by
            # dt rows (wrap-around rows are masked away at the pooling step).
            # The shifted copies are tiny (B*S, E) slabs, so the slice+concat is
            # negligible compared to the weight DMA.
            cols = [emb]
            for dt in range(1, MAXF):
                cols.append(jnp.concatenate([emb[dt:, :], emb[:dt, :]], axis=0))
            emb_win = jnp.concatenate(cols, axis=1)                   # (B*S, MAXF*E)

            # One wide MXU matmul replaces the 14 per-(filter, tap) matmuls.
            conv = jnp.dot(emb_win.astype(jnp.bfloat16), convw_ref[...],
                           preferred_element_type=jnp.float32)        # (B*S, FD)
            conv = jnp.maximum(conv + convb_ref[...], 0.0)            # bias + ReLU
            conv = conv.reshape(B, S, FD)                             # layout-free (S == 8)

            # Mask sequence positions without a full window (per-filter threshold);
            # safe because post-ReLU values are >= 0.  Then max-pool over time.
            sidx = jax.lax.broadcasted_iota(jnp.int32, (B, S, FD), 1)
            valid = sidx < nt_ref[...].reshape(1, 1, FD)
            pred0 = jnp.max(jnp.where(valid, conv, 0.0), axis=1)      # (B, FD)

            pred0_full[...] = pred0
            if KB * KBLK > FD:
                padded = jnp.concatenate(
                    [pred0, jnp.zeros((B, KB * KBLK - FD), jnp.float32)], axis=1)
            else:
                padded = pred0
            for kk in range(KB):                                      # aligned lane slices
                pred0_chunks[kk] = padded[:, kk * KBLK:(kk + 1) * KBLK]
            hwacc[...] = jnp.zeros((B, FD), jnp.float32)

        # ---- every step: accumulate one K-block of the highway matmul ----------
        chunk = pred0_chunks[k]                                       # (B, KBLK) f32
        hwacc[...] = hwacc[...] + jnp.dot(chunk.astype(jnp.bfloat16), hww_ref[...],
                                          preferred_element_type=jnp.float32)

        # ---- last step: highway gate + feature2out + out2logits ----------------
        @pl.when(k == KB - 1)
        def _():
            hw = hwacc[...] + hwb_ref[...]                            # (B, FD)
            sig = pl.reciprocal(1.0 + jnp.exp(-hw), approx=True)      # sigmoid (EUP)
            pred0 = pred0_full[...]
            pred = sig * jnp.maximum(hw, 0.0) + (1.0 - sig) * pred0
            # TODO(synk): nn.Dropout(p=0.25) is stochastic; eval-mode identity here.
            h100 = jnp.dot(pred.astype(jnp.bfloat16), f2ow_ref[...],
                           preferred_element_type=jnp.float32) + f2ob_ref[...]
            logits = jnp.dot(h100, o2lw_ref[...],
                             preferred_element_type=jnp.float32) + o2lb_ref[...]
            out_ref[...] = logits                                     # (B, 1)

    return kernel


def relgan_d_forward(inp_bsv, params, filter_sizes, kblk=256):
    B, S, V = inp_bsv.shape
    E = params["embw"].shape[1]
    nfs = [params[f"conv_b{i}"].shape[1] for i in range(len(filter_sizes))]
    FD = sum(nfs)
    MAXF = max(filter_sizes)

    inp_flat = inp_bsv.reshape(B * S, V).astype(jnp.float32)

    # --- one-time weight packing (would be done at parameter-load time in practice) ---
    # Fused im2col conv weight (MAXF*E, FD) in bf16, taps stacked along K and
    # zero-padded so every filter shares the same contraction depth.
    wblocks = []
    for fsz, nf, i in zip(filter_sizes, nfs, range(len(filter_sizes))):
        w = params[f"conv_w{i}"].reshape(fsz * E, nf)
        if fsz < MAXF:
            w = jnp.concatenate([w, jnp.zeros(((MAXF - fsz) * E, nf), w.dtype)], axis=0)
        wblocks.append(w)
    convw = jnp.concatenate(wblocks, axis=1).astype(jnp.bfloat16)     # (MAXF*E, FD)
    convb = jnp.concatenate([params[f"conv_b{i}"] for i in range(len(filter_sizes))],
                            axis=1)                                   # (1, FD) f32
    # Number of valid conv positions per output column (per filter size).
    nt = jnp.concatenate([jnp.full((1, nf), S - fsz + 1, jnp.int32)
                          for fsz, nf in zip(filter_sizes, nfs)], axis=1)

    # Highway weight streamed in KB blocks of kblk rows; K dim zero-padded.
    KB = pl.cdiv(FD, kblk)
    KPAD = KB * kblk
    hww = params["hw_w"].astype(jnp.bfloat16)
    if KPAD > FD:
        hww = jnp.concatenate([hww, jnp.zeros((KPAD - FD, FD), jnp.bfloat16)], axis=0)
    f2ow = params["f2o_w"].astype(jnp.bfloat16)

    def full_spec(arr):
        return pl.BlockSpec(arr.shape, lambda k: (0,) * arr.ndim)

    args = (inp_flat, params["embw"], convw, convb, nt,
            hww, params["hw_b"], f2ow, params["f2o_b"],
            params["o2l_w"], params["o2l_b"])
    in_specs = [full_spec(inp_flat), full_spec(params["embw"]), full_spec(convw),
                full_spec(convb), full_spec(nt),
                pl.BlockSpec((kblk, FD), lambda k: (k, 0)),           # streamed hw_w
                full_spec(params["hw_b"]), full_spec(f2ow), full_spec(params["f2o_b"]),
                full_spec(params["o2l_w"]), full_spec(params["o2l_b"])]

    kernel = _make_relgan_d_kernel(B, S, E, FD, MAXF, KB, kblk)
    out = pl.pallas_call(
        kernel,
        out_shape=jax.ShapeDtypeStruct((B, 1), jnp.float32),
        grid_spec=pltpu.PrefetchScalarGridSpec(
            num_scalar_prefetch=0,
            grid=(KB,),
            in_specs=in_specs,
            out_specs=pl.BlockSpec((B, 1), lambda k: (0, 0)),
            scratch_shapes=[pltpu.VMEM((KB, B, kblk), jnp.float32),   # pred0 K-chunks
                            pltpu.VMEM((B, FD), jnp.float32),         # pred0 (full)
                            pltpu.VMEM((B, FD), jnp.float32)]),       # highway accum
        compiler_params=pltpu.CompilerParams(
            dimension_semantics=("arbitrary",)),
    )(*args)
    return out[:, 0]                 # (B * num_rep,), num_rep == 1


def init_params(key, V, E, filter_sizes, num_filters, feature_dim):
    # init_params(): torch.nn.init.uniform_(p, -0.05, 0.05) for every parameter.
    def u(k, shape):
        return jax.random.uniform(k, shape, jnp.float32, -0.05, 0.05)
    keys = jax.random.split(key, 16)
    params = {"embw": u(keys[0], (V, E))}                             # Linear(V, E).T
    for i, (fsz, nf) in enumerate(zip(filter_sizes, num_filters)):
        params[f"conv_w{i}"] = u(keys[1 + 2 * i], (fsz, E, nf))       # Conv2d weight
        params[f"conv_b{i}"] = u(keys[2 + 2 * i], (1, nf))
    params["hw_w"] = u(keys[9], (feature_dim, feature_dim))
    params["hw_b"] = u(keys[10], (1, feature_dim))
    params["f2o_w"] = u(keys[11], (feature_dim, 100))
    params["f2o_b"] = u(keys[12], (1, 100))
    params["o2l_w"] = u(keys[13], (100, 1))
    params["o2l_b"] = u(keys[14], (1, 1))
    return params


def relgan_d_reference(inp_bsv, params, filter_sizes):
    # Plain-JAX (f32) reference reproducing the torch forward for validation.
    B, S, V = inp_bsv.shape
    emb = jnp.einsum("bsv,ve->bse", inp_bsv.astype(jnp.float32), params["embw"])
    pools = []
    for i, fsz in enumerate(filter_sizes):
        w = params[f"conv_w{i}"]
        b = params[f"conv_b{i}"]
        outs = []
        for t in range(S - fsz + 1):
            win = emb[:, t:t + fsz, :]
            outs.append(jnp.einsum("bfe,fen->bn", win, w) + b)
        con = jnp.maximum(jnp.stack(outs, axis=1), 0.0)
        pools.append(con.max(axis=1))
    pred0 = jnp.concatenate(pools, axis=1)
    hw = pred0 @ params["hw_w"] + params["hw_b"]
    sig = jax.nn.sigmoid(hw)
    pred = sig * jnp.maximum(hw, 0.0) + (1.0 - sig) * pred0
    pred = pred @ params["f2o_w"] + params["f2o_b"]
    logits = pred @ params["o2l_w"] + params["o2l_b"]
    return logits[:, 0]


if __name__ == "__main__":
    # Small shapes consistent with the module: inp is (batch, seq_len, vocab_size),
    # discriminator_embedding_dim = 32, num_rep = 1 (emb_dim_single == embed_dim).
    B, S, V, E = 2, 8, 16, 32
    num_rep = 1
    filter_sizes = [2, 3, 4, 5]
    num_filters = [300, 300, 300, 300]
    feature_dim = sum(num_filters)

    key = jax.random.PRNGKey(0)
    k_inp, k_par = jax.random.split(key)
    # soft one-hot (gumbel-softmax-like) distribution over the vocabulary per token
    inp = jax.nn.softmax(3.0 * jax.random.normal(k_inp, (B, S, V), jnp.float32), axis=-1)
    params = init_params(k_par, V, E, filter_sizes, num_filters, feature_dim)

    logits = relgan_d_forward(inp, params, filter_sizes)
    logits = jax.block_until_ready(logits)

    ref = relgan_d_reference(inp, params, filter_sizes)
    np.testing.assert_allclose(np.asarray(logits), np.asarray(ref), rtol=1e-2, atol=1e-2)
    assert logits.shape == (B * num_rep,)
    print("KERNEL_OK")
</pallas_src>

<mosaic_0001>
module attributes {stable_mosaic.version = 11 : i64} {
  func.func @kernel(%arg0: i32, %arg1: memref<16x16xf32, #tpu.memory_space<vmem>>, %arg2: memref<16x32xf32, #tpu.memory_space<vmem>>, %arg3: memref<160x1200xbf16, #tpu.memory_space<vmem>>, %arg4: memref<1x1200xf32, #tpu.memory_space<vmem>>, %arg5: memref<1x1200xi32, #tpu.memory_space<vmem>>, %arg6: memref<256x1200xbf16, #tpu.memory_space<vmem>>, %arg7: memref<1x1200xf32, #tpu.memory_space<vmem>>, %arg8: memref<1200x100xbf16, #tpu.memory_space<vmem>>, %arg9: memref<1x100xf32, #tpu.memory_space<vmem>>, %arg10: memref<100x1xf32, #tpu.memory_space<vmem>>, %arg11: memref<1x1xf32, #tpu.memory_space<vmem>>, %arg12: memref<2x1xf32, #tpu.memory_space<vmem>>, %arg13: memref<5x2x256xf32, #tpu.memory_space<vmem>>, %arg14: memref<2x1200xf32, #tpu.memory_space<vmem>>, %arg15: memref<2x1200xf32, #tpu.memory_space<vmem>>) attributes {dimension_semantics = [#tpu.dimension_semantics<arbitrary>], iteration_bounds = array<i64: 5>, scalar_prefetch = 0 : i64, scratch_operands = 3 : i64, tpu.core_type = #tpu.core_type<tc>, window_params = [{pipeline_mode = #tpu.pipeline_mode<synchronous>, transform_indices = @transform_0, window_bounds = array<i64: 16, 16>}, {pipeline_mode = #tpu.pipeline_mode<synchronous>, transform_indices = @transform_1, window_bounds = array<i64: 16, 32>}, {pipeline_mode = #tpu.pipeline_mode<synchronous>, transform_indices = @transform_2, window_bounds = array<i64: 160, 1200>}, {pipeline_mode = #tpu.pipeline_mode<synchronous>, transform_indices = @transform_3, window_bounds = array<i64: 1, 1200>}, {pipeline_mode = #tpu.pipeline_mode<synchronous>, transform_indices = @transform_4, window_bounds = array<i64: 1, 1200>}, {transform_indices = @transform_5, window_bounds = array<i64: 256, 1200>}, {pipeline_mode = #tpu.pipeline_mode<synchronous>, transform_indices = @transform_6, window_bounds = array<i64: 1, 1200>}, {pipeline_mode = #tpu.pipeline_mode<synchronous>, transform_indices = @transform_7, window_bounds = array<i64: 1200, 100>}, {pipeline_mode = #tpu.pipeline_mode<synchronous>, transform_indices = @transform_8, window_bounds = array<i64: 1, 100>}, {pipeline_mode = #tpu.pipeline_mode<synchronous>, transform_indices = @transform_9, window_bounds = array<i64: 100, 1>}, {pipeline_mode = #tpu.pipeline_mode<synchronous>, transform_indices = @transform_10, window_bounds = array<i64: 1, 1>}, {pipeline_mode = #tpu.pipeline_mode<synchronous>, transform_indices = @transform_11, window_bounds = array<i64: 2, 1>}]} {
    %c0_i32 = arith.constant 0 : i32
    %0 = arith.cmpi eq, %arg0, %c0_i32 : i32
    %1 = arith.extui %0 : i1 to i32
    %c0_i32_0 = arith.constant 0 : i32
    %2 = arith.cmpi ne, %1, %c0_i32_0 : i32
    scf.if %2 {
      %c0_9 = arith.constant 0 : index
      %c0_10 = arith.constant 0 : index
      %15 = vector.load %arg1[%c0_9, %c0_10] : memref<16x16xf32, #tpu.memory_space<vmem>>, vector<16x16xf32>
      %c0_11 = arith.constant 0 : index
      %c0_12 = arith.constant 0 : index
      %16 = vector.load %arg2[%c0_11, %c0_12] : memref<16x32xf32, #tpu.memory_space<vmem>>, vector<16x32xf32>
      %cst_13 = arith.constant dense<0.000000e+00> : vector<16x32xf32>
      %17 = tpu.matmul %15, %16, %cst_13 {dimension_numbers = #tpu.dot_dimension_numbers<[1], [0], [0], [1], [0, 0, 1, 1], [], []>} : vector<16x16xf32>, vector<16x32xf32>, vector<16x32xf32> -> vector<16x32xf32>
      %18 = vector.extract_strided_slice %17 {offsets = [1, 0], sizes = [15, 32], strides = [1, 1]} : vector<16x32xf32> to vector<15x32xf32>
      %19 = vector.extract_strided_slice %17 {offsets = [0, 0], sizes = [1, 32], strides = [1, 1]} : vector<16x32xf32> to vector<1x32xf32>
      %20 = tpu.concatenate %18, %19 in 0 : vector<15x32xf32>, vector<1x32xf32> -> vector<16x32xf32>
      %21 = vector.extract_strided_slice %17 {offsets = [2, 0], sizes = [14, 32], strides = [1, 1]} : vector<16x32xf32> to vector<14x32xf32>
      %22 = vector.extract_strided_slice %17 {offsets = [0, 0], sizes = [2, 32], strides = [1, 1]} : vector<16x32xf32> to vector<2x32xf32>
      %23 = tpu.concatenate %21, %22 in 0 : vector<14x32xf32>, vector<2x32xf32> -> vector<16x32xf32>
      %24 = vector.extract_strided_slice %17 {offsets = [3, 0], sizes = [13, 32], strides = [1, 1]} : vector<16x32xf32> to vector<13x32xf32>
      %25 = vector.extract_strided_slice %17 {offsets = [0, 0], sizes = [3, 32], strides = [1, 1]} : vector<16x32xf32> to vector<3x32xf32>
      %26 = tpu.concatenate %24, %25 in 0 : vector<13x32xf32>, vector<3x32xf32> -> vector<16x32xf32>
      %27 = vector.extract_strided_slice %17 {offsets = [4, 0], sizes = [12, 32], strides = [1, 1]} : vector<16x32xf32> to vector<12x32xf32>
      %28 = vector.extract_strided_slice %17 {offsets = [0, 0], sizes = [4, 32], strides = [1, 1]} : vector<16x32xf32> to vector<4x32xf32>
      %29 = tpu.concatenate %27, %28 in 0 : vector<12x32xf32>, vector<4x32xf32> -> vector<16x32xf32>
      %30 = tpu.concatenate %17, %20, %23, %26, %29 in 1 : vector<16x32xf32>, vector<16x32xf32>, vector<16x32xf32>, vector<16x32xf32>, vector<16x32xf32> -> vector<16x160xf32>
      %31 = arith.truncf %30 : vector<16x160xf32> to vector<16x160xbf16>
      %c0_14 = arith.constant 0 : index
      %c0_15 = arith.constant 0 : index
      %32 = vector.load %arg3[%c0_14, %c0_15] : memref<160x1200xbf16, #tpu.memory_space<vmem>>, vector<160x1200xbf16>
      %cst_16 = arith.constant dense<0.000000e+00> : vector<16x1200xf32>
      %33 = tpu.matmul %31, %32, %cst_16 {dimension_numbers = #tpu.dot_dimension_numbers<[1], [0], [0], [1], [0, 0, 1, 1], [], []>} : vector<16x160xbf16>, vector<160x1200xbf16>, vector<16x1200xf32> -> vector<16x1200xf32>
      %c0_17 = arith.constant 0 : index
      %c0_18 = arith.constant 0 : index
      %34 = vector.load %arg4[%c0_17, %c0_18] : memref<1x1200xf32, #tpu.memory_space<vmem>>, vector<1x1200xf32>
      %35 = vector.broadcast %34 : vector<1x1200xf32> to vector<16x1200xf32>
      %36 = arith.addf %33, %35 : vector<16x1200xf32>
      %cst_19 = arith.constant 0.000000e+00 : f32
      %37 = vector.broadcast %cst_19 : f32 to vector<16x1200xf32>
      %38 = arith.maximumf %36, %37 : vector<16x1200xf32>
      %39 = vector.shape_cast %38 : vector<16x1200xf32> to vector<2x8x1200xf32>
      %40 = tpu.iota {dimensions = array<i32: 1>} : vector<2x8x1200xi32>
      %c0_20 = arith.constant 0 : index
      %c0_21 = arith.constant 0 : index
      %41 = vector.load %arg5[%c0_20, %c0_21] : memref<1x1200xi32, #tpu.memory_space<vmem>>, vector<1x1200xi32>
      %42 = vector.shape_cast %41 : vector<1x1200xi32> to vector<1x1x1200xi32>
      %43 = vector.broadcast %42 : vector<1x1x1200xi32> to vector<2x8x1200xi32>
      %44 = arith.cmpi slt, %40, %43 : vector<2x8x1200xi32>
      %cst_22 = arith.constant 0.000000e+00 : f32
      %45 = vector.broadcast %cst_22 : f32 to vector<2x8x1200xf32>
      %46 = arith.select %44, %39, %45 : vector<2x8x1200xi1>, vector<2x8x1200xf32>
      %cst_23 = arith.constant dense<0xFF800000> : vector<2x1200xf32>
      %47 = vector.multi_reduction <maximumf>, %46, %cst_23 [1] : vector<2x8x1200xf32> to vector<2x1200xf32>
      %c0_24 = arith.constant 0 : index
      %c0_25 = arith.constant 0 : index
      %48 = vector.load %arg14[%c0_24, %c0_25] : memref<2x1200xf32, #tpu.memory_space<vmem>>, vector<2x1200xf32>
      tpu.vector_store %arg14[%c0_24, %c0_25], %47 {strides = array<i32>} : memref<2x1200xf32, #tpu.memory_space<vmem>>, vector<2x1200xf32>,
      %cst_26 = arith.constant 0.000000e+00 : f32
      %49 = vector.broadcast %cst_26 : f32 to vector<2x80xf32>
      %50 = tpu.concatenate %47, %49 in 1 : vector<2x1200xf32>, vector<2x80xf32> -> vector<2x1280xf32>
      %51 = vector.extract_strided_slice %50 {offsets = [0, 0], sizes = [2, 256], strides = [1, 1]} : vector<2x1280xf32> to vector<2x256xf32>
      %c0_27 = arith.constant 0 : index
      %c0_28 = arith.constant 0 : index
      %c0_29 = arith.constant 0 : index
      %52 = vector.load %arg13[%c0_27, %c0_28, %c0_29] : memref<5x2x256xf32, #tpu.memory_space<vmem>>, vector<1x2x256xf32>
      %53 = vector.shape_cast %52 : vector<1x2x256xf32> to vector<2x256xf32>
      %54 = vector.shape_cast %51 : vector<2x256xf32> to vector<1x2x256xf32>
      tpu.vector_store %arg13[%c0_27, %c0_28, %c0_29], %54 {strides = array<i32>} : memref<5x2x256xf32, #tpu.memory_space<vmem>>, vector<1x2x256xf32>,
      %55 = vector.extract_strided_slice %50 {offsets = [0, 256], sizes = [2, 256], strides = [1, 1]} : vector<2x1280xf32> to vector<2x256xf32>
      %c1 = arith.constant 1 : index
      %c0_30 = arith.constant 0 : index
      %c0_31 = arith.constant 0 : index
      %56 = vector.load %arg13[%c1, %c0_30, %c0_31] : memref<5x2x256xf32, #tpu.memory_space<vmem>>, vector<1x2x256xf32>
      %57 = vector.shape_cast %56 : vector<1x2x256xf32> to vector<2x256xf32>
      %58 = vector.shape_cast %55 : vector<2x256xf32> to vector<1x2x256xf32>
      tpu.vector_store %arg13[%c1, %c0_30, %c0_31], %58 {strides = array<i32>} : memref<5x2x256xf32, #tpu.memory_space<vmem>>, vector<1x2x256xf32>,
      %59 = vector.extract_strided_slice %50 {offsets = [0, 512], sizes = [2, 256], strides = [1, 1]} : vector<2x1280xf32> to vector<2x256xf32>
      %c2 = arith.constant 2 : index
      %c0_32 = arith.constant 0 : index
      %c0_33 = arith.constant 0 : index
      %60 = vector.load %arg13[%c2, %c0_32, %c0_33] : memref<5x2x256xf32, #tpu.memory_space<vmem>>, vector<1x2x256xf32>
      %61 = vector.shape_cast %60 : vector<1x2x256xf32> to vector<2x256xf32>
      %62 = vector.shape_cast %59 : vector<2x256xf32> to vector<1x2x256xf32>
      tpu.vector_store %arg13[%c2, %c0_32, %c0_33], %62 {strides = array<i32>} : memref<5x2x256xf32, #tpu.memory_space<vmem>>, vector<1x2x256xf32>,
      %63 = vector.extract_strided_slice %50 {offsets = [0, 768], sizes = [2, 256], strides = [1, 1]} : vector<2x1280xf32> to vector<2x256xf32>
      %c3 = arith.constant 3 : index
      %c0_34 = arith.constant 0 : index
      %c0_35 = arith.constant 0 : index
      %64 = vector.load %arg13[%c3, %c0_34, %c0_35] : memref<5x2x256xf32, #tpu.memory_space<vmem>>, vector<1x2x256xf32>
      %65 = vector.shape_cast %64 : vector<1x2x256xf32> to vector<2x256xf32>
      %66 = vector.shape_cast %63 : vector<2x256xf32> to vector<1x2x256xf32>
      tpu.vector_store %arg13[%c3, %c0_34, %c0_35], %66 {strides = array<i32>} : memref<5x2x256xf32, #tpu.memory_space<vmem>>, vector<1x2x256xf32>,
      %67 = vector.extract_strided_slice %50 {offsets = [0, 1024], sizes = [2, 256], strides = [1, 1]} : vector<2x1280xf32> to vector<2x256xf32>
      %c4 = arith.constant 4 : index
      %c0_36 = arith.constant 0 : index
      %c0_37 = arith.constant 0 : index
      %68 = vector.load %arg13[%c4, %c0_36, %c0_37] : memref<5x2x256xf32, #tpu.memory_space<vmem>>, vector<1x2x256xf32>
      %69 = vector.shape_cast %68 : vector<1x2x256xf32> to vector<2x256xf32>
      %70 = vector.shape_cast %67 : vector<2x256xf32> to vector<1x2x256xf32>
      tpu.vector_store %arg13[%c4, %c0_36, %c0_37], %70 {strides = array<i32>} : memref<5x2x256xf32, #tpu.memory_space<vmem>>, vector<1x2x256xf32>,
      %cst_38 = arith.constant 0.000000e+00 : f32
      %71 = vector.broadcast %cst_38 : f32 to vector<2x1200xf32>
      %c0_39 = arith.constant 0 : index
      %c0_40 = arith.constant 0 : index
      %72 = vector.load %arg15[%c0_39, %c0_40] : memref<2x1200xf32, #tpu.memory_space<vmem>>, vector<2x1200xf32>
      tpu.vector_store %arg15[%c0_39, %c0_40], %71 {strides = array<i32>} : memref<2x1200xf32, #tpu.memory_space<vmem>>, vector<2x1200xf32>,
    } else {
    }
    %3 = arith.index_cast %arg0 : i32 to index
    %c0 = arith.constant 0 : index
    %c0_1 = arith.constant 0 : index
    %4 = vector.load %arg13[%3, %c0, %c0_1] : memref<5x2x256xf32, #tpu.memory_space<vmem>>, vector<1x2x256xf32>
    %5 = vector.shape_cast %4 : vector<1x2x256xf32> to vector<2x256xf32>
    %c0_2 = arith.constant 0 : index
    %c0_3 = arith.constant 0 : index
    %6 = vector.load %arg15[%c0_2, %c0_3] : memref<2x1200xf32, #tpu.memory_space<vmem>>, vector<2x1200xf32>
    %7 = arith.truncf %5 : vector<2x256xf32> to vector<2x256xbf16>
    %c0_4 = arith.constant 0 : index
    %c0_5 = arith.constant 0 : index
    %8 = vector.load %arg6[%c0_4, %c0_5] : memref<256x1200xbf16, #tpu.memory_space<vmem>>, vector<256x1200xbf16>
    %cst = arith.constant dense<0.000000e+00> : vector<2x1200xf32>
    %9 = tpu.matmul %7, %8, %cst {dimension_numbers = #tpu.dot_dimension_numbers<[1], [0], [0], [1], [0, 0, 1, 1], [], []>} : vector<2x256xbf16>, vector<256x1200xbf16>, vector<2x1200xf32> -> vector<2x1200xf32>
    %10 = arith.addf %6, %9 : vector<2x1200xf32>
    %c0_6 = arith.constant 0 : index
    %c0_7 = arith.constant 0 : index
    %11 = vector.load %arg15[%c0_6, %c0_7] : memref<2x1200xf32, #tpu.memory_space<vmem>>, vector<2x1200xf32>
    tpu.vector_store %arg15[%c0_6, %c0_7], %10 {strides = array<i32>} : memref<2x1200xf32, #tpu.memory_space<vmem>>, vector<2x1200xf32>,
    %c4_i32 = arith.constant 4 : i32
    %12 = arith.cmpi eq, %arg0, %c4_i32 : i32
    %13 = arith.extui %12 : i1 to i32
    %c0_i32_8 = arith.constant 0 : i32
    %14 = arith.cmpi ne, %13, %c0_i32_8 : i32
    scf.if %14 {
      %c0_9 = arith.constant 0 : index
      %c0_10 = arith.constant 0 : index
      %15 = vector.load %arg15[%c0_9, %c0_10] : memref<2x1200xf32, #tpu.memory_space<vmem>>, vector<2x1200xf32>
      %c0_11 = arith.constant 0 : index
      %c0_12 = arith.constant 0 : index
      %16 = vector.load %arg7[%c0_11, %c0_12] : memref<1x1200xf32, #tpu.memory_space<vmem>>, vector<1x1200xf32>
      %17 = vector.broadcast %16 : vector<1x1200xf32> to vector<2x1200xf32>
      %18 = arith.addf %15, %17 : vector<2x1200xf32>
      %cst_13 = arith.constant 0.000000e+00 : f32
      %19 = vector.broadcast %cst_13 : f32 to vector<2x1200xf32>
      %20 = arith.subf %19, %18 : vector<2x1200xf32>
      %21 = math.exp %20 : vector<2x1200xf32>
      %cst_14 = arith.constant 1.000000e+00 : f32
      %22 = vector.broadcast %cst_14 : f32 to vector<2x1200xf32>
      %23 = arith.addf %22, %21 : vector<2x1200xf32>
      %24 = tpu.reciprocal %23 {approx = true} : vector<2x1200xf32> -> vector<2x1200xf32>
      %c0_15 = arith.constant 0 : index
      %c0_16 = arith.constant 0 : index
      %25 = vector.load %arg14[%c0_15, %c0_16] : memref<2x1200xf32, #tpu.memory_space<vmem>>, vector<2x1200xf32>
      %cst_17 = arith.constant 0.000000e+00 : f32
      %26 = vector.broadcast %cst_17 : f32 to vector<2x1200xf32>
      %27 = arith.maximumf %18, %26 : vector<2x1200xf32>
      %28 = arith.mulf %24, %27 : vector<2x1200xf32>
      %cst_18 = arith.constant 1.000000e+00 : f32
      %29 = vector.broadcast %cst_18 : f32 to vector<2x1200xf32>
      %30 = arith.subf %29, %24 : vector<2x1200xf32>
      %31 = arith.mulf %30, %25 : vector<2x1200xf32>
      %32 = arith.addf %28, %31 : vector<2x1200xf32>
      %33 = arith.truncf %32 : vector<2x1200xf32> to vector<2x1200xbf16>
      %c0_19 = arith.constant 0 : index
      %c0_20 = arith.constant 0 : index
      %34 = vector.load %arg8[%c0_19, %c0_20] : memref<1200x100xbf16, #tpu.memory_space<vmem>>, vector<1200x100xbf16>
      %cst_21 = arith.constant dense<0.000000e+00> : vector<2x100xf32>
      %35 = tpu.matmul %33, %34, %cst_21 {dimension_numbers = #tpu.dot_dimension_numbers<[1], [0], [0], [1], [0, 0, 1, 1], [], []>} : vector<2x1200xbf16>, vector<1200x100xbf16>, vector<2x100xf32> -> vector<2x100xf32>
      %c0_22 = arith.constant 0 : index
      %c0_23 = arith.constant 0 : index
      %36 = vector.load %arg9[%c0_22, %c0_23] : memref<1x100xf32, #tpu.memory_space<vmem>>, vector<1x100xf32>
      %37 = vector.broadcast %36 : vector<1x100xf32> to vector<2x100xf32>
      %38 = arith.addf %35, %37 : vector<2x100xf32>
      %c0_24 = arith.constant 0 : index
      %c0_25 = arith.constant 0 : index
      %39 = vector.load %arg10[%c0_24, %c0_25] : memref<100x1xf32, #tpu.memory_space<vmem>>, vector<100x1xf32>
      %cst_26 = arith.constant dense<0.000000e+00> : vector<2x1xf32>
      %40 = tpu.matmul %38, %39, %cst_26 {dimension_numbers = #tpu.dot_dimension_numbers<[1], [0], [0], [1], [0, 0, 1, 1], [], []>} : vector<2x100xf32>, vector<100x1xf32>, vector<2x1xf32> -> vector<2x1xf32>
      %c0_27 = arith.constant 0 : index
      %c0_28 = arith.constant 0 : index
      %41 = vector.load %arg11[%c0_27, %c0_28] : memref<1x1xf32, #tpu.memory_space<vmem>>, vector<1x1xf32>
      %42 = vector.broadcast %41 : vector<1x1xf32> to vector<2x1xf32>
      %43 = arith.addf %40, %42 : vector<2x1xf32>
      %c0_29 = arith.constant 0 : index
      %c0_30 = arith.constant 0 : index
      %44 = vector.load %arg12[%c0_29, %c0_30] : memref<2x1xf32, #tpu.memory_space<vmem>>, vector<2x1xf32>
      tpu.vector_store %arg12[%c0_29, %c0_30], %43 {strides = array<i32>} : memref<2x1xf32, #tpu.memory_space<vmem>>, vector<2x1xf32>,
    } else {
    }
    return
  }
  func.func @transform_0(%arg0: i32) -> (i32, i32) {
    %c0_i32 = arith.constant 0 : i32
    %c0_i32_0 = arith.constant 0 : i32
    %c0_i32_1 = arith.constant 0 : i32
    return %c0_i32, %c0_i32_0 : i32, i32
  }
  func.func @transform_1(%arg0: i32) -> (i32, i32) {
    %c0_i32 = arith.constant 0 : i32
    %c0_i32_0 = arith.constant 0 : i32
    %c0_i32_1 = arith.constant 0 : i32
    return %c0_i32, %c0_i32_0 : i32, i32
  }
  func.func @transform_2(%arg0: i32) -> (i32, i32) {
    %c0_i32 = arith.constant 0 : i32
    %c0_i32_0 = arith.constant 0 : i32
    %c0_i32_1 = arith.constant 0 : i32
    return %c0_i32, %c0_i32_0 : i32, i32
  }
  func.func @transform_3(%arg0: i32) -> (i32, i32) {
    %c0_i32 = arith.constant 0 : i32
    %c0_i32_0 = arith.constant 0 : i32
    %c0_i32_1 = arith.constant 0 : i32
    return %c0_i32, %c0_i32_0 : i32, i32
  }
  func.func @transform_4(%arg0: i32) -> (i32, i32) {
    %c0_i32 = arith.constant 0 : i32
    %c0_i32_0 = arith.constant 0 : i32
    %c0_i32_1 = arith.constant 0 : i32
    return %c0_i32, %c0_i32_0 : i32, i32
  }
  func.func @transform_5(%arg0: i32) -> (i32, i32) {
    %c0_i32 = arith.constant 0 : i32
    %c0_i32_0 = arith.constant 0 : i32
    return %arg0, %c0_i32 : i32, i32
  }
  func.func @transform_6(%arg0: i32) -> (i32, i32) {
    %c0_i32 = arith.constant 0 : i32
    %c0_i32_0 = arith.constant 0 : i32
    %c0_i32_1 = arith.constant 0 : i32
    return %c0_i32, %c0_i32_0 : i32, i32
  }
  func.func @transform_7(%arg0: i32) -> (i32, i32) {
    %c0_i32 = arith.constant 0 : i32
    %c0_i32_0 = arith.constant 0 : i32
    %c0_i32_1 = arith.constant 0 : i32
    return %c0_i32, %c0_i32_0 : i32, i32
  }
  func.func @transform_8(%arg0: i32) -> (i32, i32) {
    %c0_i32 = arith.constant 0 : i32
    %c0_i32_0 = arith.constant 0 : i32
    %c0_i32_1 = arith.constant 0 : i32
    return %c0_i32, %c0_i32_0 : i32, i32
  }
  func.func @transform_9(%arg0: i32) -> (i32, i32) {
    %c0_i32 = arith.constant 0 : i32
    %c0_i32_0 = arith.constant 0 : i32
    %c0_i32_1 = arith.constant 0 : i32
    return %c0_i32, %c0_i32_0 : i32, i32
  }
  func.func @transform_10(%arg0: i32) -> (i32, i32) {
    %c0_i32 = arith.constant 0 : i32
    %c0_i32_0 = arith.constant 0 : i32
    %c0_i32_1 = arith.constant 0 : i32
    return %c0_i32, %c0_i32_0 : i32, i32
  }
  func.func @transform_11(%arg0: i32) -> (i32, i32) {
    %c0_i32 = arith.constant 0 : i32
    %c0_i32_0 = arith.constant 0 : i32
    %c0_i32_1 = arith.constant 0 : i32
    return %c0_i32, %c0_i32_0 : i32, i32
  }
}

</mosaic_0001>

<bundles_post_ra>
// kernel: tpu_custom_call.1
= control target key start
LH: loop header
LB: loop body
LE: loop exit
PB: predicated region body
PF: predicated region fallthrough
CT: control target
= control target key end

     0   :  { %s5341_s19 = smov 0   ;;  %s6362_s0 = inlined_call_operand.vmem [shape: f32[16,16], index: 0, kind: input, shape index: {}]   ;;  %s6363_s1 = inlined_call_operand.vmem [shape: f32[16,32], index: 1, kind: input, shape index: {}]   ;;  %s6364_s2 = inlined_call_operand.vmem [shape: bf16[160,1200], index: 2, kind: input, shape index: {}]   ;;  %s6365_s3 = inlined_call_operand.vmem [shape: f32[1,1200], index: 3, kind: input, shape index: {}]   ;;  %s6366_s4 = inlined_call_operand.vmem [shape: s32[1,1200], index: 4, kind: input, shape index: {}]   ;;  %s6367_s5 = inlined_call_operand.vmem [shape: bf16[1280,1200], index: 5, kind: input, shape index: {}]   ;;  %s6368_s6 = inlined_call_operand.vmem [shape: f32[1,1200], index: 6, kind: input, shape index: {}]   ;;  %s6369_s7 = inlined_call_operand.vmem [shape: bf16[1200,100], index: 7, kind: input, shape index: {}]   ;;  %s6370_s8 = inlined_call_operand.vmem [shape: f32[1,100], index: 8, kind: input, shape index: {}]   ;;  %s6371_s9 = inlined_call_operand.vmem [shape: f32[100,1], index: 9, kind: input, shape index: {}]   ;;  %s6372_s10 = inlined_call_operand.<no memory space> [shape: f32[1,1], index: 10, kind: input, shape index: {}]   ;;  %s6373_s11 = inlined_call_operand.vmem [shape: f32[2,1], index: 11, kind: output, shape index: {}]  }
   0x1   :  { %v16_v0 = vstv %s6372_s10 }
   0x2   :  { %17 = vst [vmem:[#allocation5] sm:$0x1] %v16_v0 }
   0x3 LB: > { %s5347_s20 = sadd.s32 4294967295, %s5266_s19   ;;  %p4222_p0 = scmp.ge.s32.totalorder %s5266_s19, 1  ;;  %s5266_s19 = sphi %s5341_s19, %s23_s19  }
   0x4   : > { %p336_p1 = scmp.lt.s32.totalorder %s5266_s19, 6 }
   0x6   : > { %p337_p2 = pnand %p4222_p0, %p336_p1 }
   0x7   : > { %s4223_s21 = sshll.u32 (!%p337_p2), %s5347_s20, 5  ;;  %p4225_p4 = scmp.ne.s32.totalorder (!%p337_p2), %s5347_s20, 0 }
   0x8   : > { %340 = sbr.rel (%p337_p2) target bundleno = 1625 (0x659), region = 64  ;;  %p373_p3 = scmp.lt.s32.totalorder (!%p337_p2), %s4223_s21, 159 }
   0xf   : > { %s6385_s21 = smov (!%p373_p3, %s4223_s21), 159  ;;  %383 = sbr.rel (%p4225_p4) target bundleno = 691 (0x2b3), region = 68 }
  0x10   : > { %s4749_s10 = smul.u32 40, %s6385_s21  ;;  %v386_v1 = vld [vmem:[%s6363_s1] sm:$0xff] (!%p4225_p4)  ;;  %v387_v2 = vld [vmem:[%s6363_s1 + $0x8] sm:$0xff] (!%p4225_p4)  ;;  %vm388_vm0 = vcmask (!%p4225_p4), 130048   ;;  %v4789_v10 = vld [vmem:[%s6364_s2 + $0x54] ss:$40 sps:$4 sm:$0xff] (!%p4225_p4)  }
  0x11   : > { %v384_v3 = vld [vmem:[%s6362_s0] sm:$0xff] (!%p4225_p4)  ;;  %v4727_v4 = vpack.c.bf16 (!%p4225_p4), %v387_v2, %v386_v1  ;;  %v385_v5 = vld [vmem:[%s6362_s0 + $0x8] sm:$0xff] (!%p4225_p4)  ;;  %v4794_v13 = vld [vmem:[%s6364_s2 + $0x50] ss:$40 sps:$4 sm:$0xff] (!%p4225_p4)   ;;  %vm493_vm1 = vcmask (!%p4225_p4), 1043456   ;;  %vm486_vm2 = vcmask (!%p4225_p4), 1044480  }
  0x12   : > { %s5355_s24 = scalar_lea.vmem %s6367_s5, %s4749_s10  ;;  %4695 = vmatprep.mubr.msk.f32.mxu0 (!%p4225_p4), %vm388_vm0, %v384_v3  ;;  %v4783_v6 = vld [vmem:[%s6364_s2 + $0x4] ss:$40 sps:$4 sm:$0xff] (!%p4225_p4)   ;;  %v4785_v7 = vld [vmem:[%s6364_s2 + $0x8] ss:$40 sps:$4 sm:$0xff] (!%p4225_p4)   ;;  %v4791_v12 = vld [vmem:[%s6364_s2 + $0x58] ss:$40 sps:$4 sm:$0xff] (!%p4225_p4)  }
  0x13   : > { %4728 = vmatprep.subr.bf16.mxu0 (!%p4225_p4), %v4727_v4  ;;  %v4787_v8 = vld [vmem:[%s6364_s2 + $0xc] ss:$40 sps:$4 sm:$0xff] (!%p4225_p4)   ;;  %v4788_v9 = vld [vmem:[%s6364_s2] ss:$40 sps:$4 sm:$0xff] (!%p4225_p4)   ;;  %1190 = vmatprep.subr.bf16.mxu1 (!%p4225_p4), %v4783_v6  ;;  %v4793_v11 = vld [vmem:[%s6364_s2 + $0x5c] ss:$40 sps:$4 sm:$0xff] (!%p4225_p4)  }
  0x14   : > { %4730 = vmatpush3.bf16.msra.mxu0 (!%p4225_p4), %v4727_v4  ;;  %1191 = vmatpush1.bf16.msra.mxu1 (!%p4225_p4), %v4788_v9  ;;  %v4795_v14 = vld [vmem:[%s6364_s2 + $0xa4] ss:$40 sps:$4 sm:$0xff] (!%p4225_p4)   ;;  %v4797_v16 = vld [vmem:[%s6364_s2 + $0xa8] ss:$40 sps:$4 sm:$0xff] (!%p4225_p4)   ;;  %v4801_v18 = vld [vmem:[%s6364_s2 + $0xf4] ss:$40 sps:$4 sm:$0xff] (!%p4225_p4)  }
  0x15   : > { %1233 = vmatprep.subr.bf16.mxu0 (!%p4225_p4), %v4787_v8  ;;  %1192 = vmatprep.subr.bf16.mxu1 (!%p4225_p4), %v4789_v10  ;;  %v4799_v15 = vld [vmem:[%s6364_s2 + $0xac] ss:$40 sps:$4 sm:$0xff] (!%p4225_p4)   ;;  %v4800_v17 = vld [vmem:[%s6364_s2 + $0xa0] ss:$40 sps:$4 sm:$0xff] (!%p4225_p4)   ;;  %v4805_v19 = vld [vmem:[%s6364_s2 + $0xfc] ss:$40 sps:$4 sm:$0xff] (!%p4225_p4)  }
  0x16   : > { %v4803_v20 = vld [vmem:[%s6364_s2 + $0xf8] ss:$40 sps:$4 sm:$0xff]   ;;  %v4807_v22 = vld [vmem:[%s6364_s2 + $0x144] ss:$40 sps:$4 sm:$0xff]   ;;  %v4809_v24 = vld [vmem:[%s6364_s2 + $0x148] ss:$40 sps:$4 sm:$0xff]  }
  0x17   : > { %4696 = vmatmul.mubr.msk.f32.vlgmr.msra.gmra.mrb[0].mxu0 %vm388_vm0, %v385_v5  ;;  %v4806_v21 = vld [vmem:[%s6364_s2 + $0xf0] ss:$40 sps:$4 sm:$0xff]   ;;  %v4811_v23 = vld [vmem:[%s6364_s2 + $0x14c] ss:$40 sps:$4 sm:$0xff]   ;;  %v4812_v25 = vld [vmem:[%s6364_s2 + $0x140] ss:$40 sps:$4 sm:$0xff]  }
  0x18   : > { %1234 = vmatpush1.bf16.msra.mxu0 %v4785_v7  ;;  %1193 = vmatpush1.bf16.msra.mxu1 %v4794_v13  ;;  %v4813_v26 = vld [vmem:[%s6364_s2 + $0x194] ss:$40 sps:$4 sm:$0xff]   ;;  %v4815_v28 = vld [vmem:[%s6364_s2 + $0x198] ss:$40 sps:$4 sm:$0xff]   ;;  %v4819_v30 = vld [vmem:[%s6364_s2 + $0x1e4] ss:$40 sps:$4 sm:$0xff]  }
  0x19   : > { %1235 = vmatprep.subr.bf16.mxu0 %v4793_v11  ;;  %1194 = vmatprep.subr.bf16.mxu1 %v4795_v14  ;;  %v4817_v27 = vld [vmem:[%s6364_s2 + $0x19c] ss:$40 sps:$4 sm:$0xff]   ;;  %v4818_v29 = vld [vmem:[%s6364_s2 + $0x190] ss:$40 sps:$4 sm:$0xff]   ;;  %v4823_v31 = vld [vmem:[%s6364_s2 + $0x1ec] ss:$40 sps:$4 sm:$0xff]  }
  0x1a   : > { %v4821_v32 = vld [vmem:[%s6364_s2 + $0x1e8] ss:$40 sps:$4 sm:$0xff]   ;;  %v4825_v34 = vld [vmem:[%s6364_s2 + $0x234] ss:$40 sps:$4 sm:$0xff]   ;;  %v4827_v36 = vld [vmem:[%s6364_s2 + $0x238] ss:$40 sps:$4 sm:$0xff]  }
  0x1b   : > { %v4824_v33 = vld [vmem:[%s6364_s2 + $0x1e0] ss:$40 sps:$4 sm:$0xff]   ;;  %v4829_v35 = vld [vmem:[%s6364_s2 + $0x23c] ss:$40 sps:$4 sm:$0xff]   ;;  %v4830_v37 = vld [vmem:[%s6364_s2 + $0x230] ss:$40 sps:$4 sm:$0xff]  }
  0x1c   : > { %1236 = vmatpush1.bf16.msra.mxu0 %v4791_v12  ;;  %1195 = vmatpush1.bf16.msra.mxu1 %v4800_v17  ;;  %v4831_v38 = vld [vmem:[%s6364_s2 + $0x284] ss:$40 sps:$4 sm:$0xff]   ;;  %v4833_v40 = vld [vmem:[%s6364_s2 + $0x288] ss:$40 sps:$4 sm:$0xff]   ;;  %v4837_v42 = vld [vmem:[%s6364_s2 + $0x2d4] ss:$40 sps:$4 sm:$0xff]  }
  0x1d   : > { %1237 = vmatprep.subr.bf16.mxu0 %v4799_v15  ;;  %1196 = vmatprep.subr.bf16.mxu1 %v4801_v18  ;;  %v4835_v39 = vld [vmem:[%s6364_s2 + $0x28c] ss:$40 sps:$4 sm:$0xff]   ;;  %v4836_v41 = vld [vmem:[%s6364_s2 + $0x280] ss:$40 sps:$4 sm:$0xff]   ;;  %v4841_v43 = vld [vmem:[%s6364_s2 + $0x2dc] ss:$40 sps:$4 sm:$0xff]  }
  0x1e   : > { %vm472_vm3 = vcmask 1046528   ;;  %v4839_v45 = vld [vmem:[%s6364_s2 + $0x2d8] ss:$40 sps:$4 sm:$0xff]   ;;  %vm522_vm4 = vcmask 261120   ;;  %vm479_vm5 = vcmask 1045504   ;;  %s5268_s13 = smov 96  }
  0x1f   : > { %v4842_v46 = vld [vmem:[%s6364_s2 + $0x2d0] ss:$40 sps:$4 sm:$0xff]   ;;  %v4845_v56 = vld [vmem:[%s6364_s2 + $0x14] ss:$40 sps:$4 sm:$0xff]   ;;  %s5269_s14 = smov 32   ;;  %s5270_s15 = smov 64  }
  0x20   : > { %1238 = vmatpush1.bf16.msra.mxu0 %v4797_v16  ;;  %1197 = vmatpush1.bf16.msra.mxu1 %v4806_v21  ;;  %v4848_v61 = vld [vmem:[%s6364_s2 + $0x1c] ss:$40 sps:$4 sm:$0xff]   ;;  %vm525_vm6 = vcmask 523264   ;;  %vm528_vm7 = vcmask 785408   ;;  %v4843_v21 = vld [vmem:[%s6364_s2 + $0x10] ss:$40 sps:$4 sm:$0xff]  }
  0x21   : > { %1239 = vmatprep.subr.bf16.mxu0 %v4805_v19  ;;  %1198 = vmatprep.subr.bf16.mxu1 %v4807_v22  ;;  %v4846_v22 = vld [vmem:[%s6364_s2 + $0x18] ss:$40 sps:$4 sm:$0xff]   ;;  %vm1758_vm8 = vcmask 1041408   ;;  %vm1759_vm9 = vcmask 388098   ;;  %vm1731_vm15 = vcmask 1041409   ;;  %vm1733_vm0 = vcmask 1043459  }
  0x22   : > { %vm5697_vm10 = vmor %vm1759_vm9, %vm1758_vm8  ;;  %vm1553_vm9 = vcmask 392192  }
  0x24   : > { %1240 = vmatpush1.bf16.msra.mxu0 %v4803_v20  ;;  %1199 = vmatpush1.bf16.msra.mxu1 %v4812_v25  ;;  %v4854_v25 = vld [vmem:[%s6364_s2 + $0x6c] ss:$40 sps:$4 sm:$0xff]  }
  0x25   : > { %1241 = vmatprep.subr.bf16.mxu0 %v4811_v23  ;;  %1200 = vmatprep.subr.bf16.mxu1 %v4813_v26  ;;  %v4849_v26 = vld [vmem:[%s6364_s2 + $0x60] ss:$40 sps:$4 sm:$0xff]  }
  0x28   : > { %1242 = vmatpush1.bf16.msra.mxu0 %v4809_v24  ;;  %1201 = vmatpush1.bf16.msra.mxu1 %v4818_v29  ;;  %v4851_v24 = vld [vmem:[%s6364_s2 + $0x64] ss:$40 sps:$4 sm:$0xff]  }
  0x29   : > { %1243 = vmatprep.subr.bf16.mxu0 %v4817_v27  ;;  %1202 = vmatprep.subr.bf16.mxu1 %v4819_v30  ;;  %v4852_v27 = vld [vmem:[%s6364_s2 + $0x68] ss:$40 sps:$4 sm:$0xff]   ;;  %v4860_v29 = vld [vmem:[%s6364_s2 + $0xbc] ss:$40 sps:$4 sm:$0xff]  }
  0x2a   : > { %v4855_v30 = vld [vmem:[%s6364_s2 + $0xb0] ss:$40 sps:$4 sm:$0xff]  }
  0x2c   : > { %1244 = vmatpush1.bf16.msra.mxu0 %v4815_v28  ;;  %1203 = vmatpush1.bf16.msra.mxu1 %v4824_v33  ;;  %v4857_v28 = vld [vmem:[%s6364_s2 + $0xb4] ss:$40 sps:$4 sm:$0xff]  }
  0x2d   : > { %1245 = vmatprep.subr.bf16.mxu0 %v4823_v31  ;;  %1204 = vmatprep.subr.bf16.mxu1 %v4825_v34  ;;  %v4858_v31 = vld [vmem:[%s6364_s2 + $0xb8] ss:$40 sps:$4 sm:$0xff]   ;;  %v4866_v33 = vld [vmem:[%s6364_s2 + $0x10c] ss:$40 sps:$4 sm:$0xff]  }
  0x2e   : > { %v4861_v34 = vld [vmem:[%s6364_s2 + $0x100] ss:$40 sps:$4 sm:$0xff]  }
  0x30   : > { %1246 = vmatpush1.bf16.msra.mxu0 %v4821_v32  ;;  %1205 = vmatpush1.bf16.msra.mxu1 %v4830_v37  ;;  %v4863_v32 = vld [vmem:[%s6364_s2 + $0x104] ss:$40 sps:$4 sm:$0xff]  }
  0x31   : > { %1247 = vmatprep.subr.bf16.mxu0 %v4829_v35  ;;  %1206 = vmatprep.subr.bf16.mxu1 %v4831_v38  ;;  %v4864_v35 = vld [vmem:[%s6364_s2 + $0x108] ss:$40 sps:$4 sm:$0xff]   ;;  %v4872_v37 = vld [vmem:[%s6364_s2 + $0x15c] ss:$40 sps:$4 sm:$0xff]  }
  0x32   : > { %v4867_v38 = vld [vmem:[%s6364_s2 + $0x150] ss:$40 sps:$4 sm:$0xff]  }
  0x34   : > { %1248 = vmatpush1.bf16.msra.mxu0 %v4827_v36  ;;  %1207 = vmatpush1.bf16.msra.mxu1 %v4836_v41  ;;  %v4869_v36 = vld [vmem:[%s6364_s2 + $0x154] ss:$40 sps:$4 sm:$0xff]  }
  0x35   : > { %1249 = vmatprep.subr.bf16.mxu0 %v4835_v39  ;;  %1208 = vmatprep.subr.bf16.mxu1 %v4837_v42  ;;  %v4870_v39 = vld [vmem:[%s6364_s2 + $0x158] ss:$40 sps:$4 sm:$0xff]   ;;  %v4878_v41 = vld [vmem:[%s6364_s2 + $0x1ac] ss:$40 sps:$4 sm:$0xff]  }
  0x36   : > { %v4873_v42 = vld [vmem:[%s6364_s2 + $0x1a0] ss:$40 sps:$4 sm:$0xff]  }
  0x38   : > { %1250 = vmatpush1.bf16.msra.mxu0 %v4833_v40  ;;  %1209 = vmatpush1.bf16.msra.mxu1 %v4842_v46  ;;  %v4875_v40 = vld [vmem:[%s6364_s2 + $0x1a4] ss:$40 sps:$4 sm:$0xff]   ;;  %v4879_v46 = vld [vmem:[%s6364_s2 + $0x1f0] ss:$40 sps:$4 sm:$0xff]  }
  0x39   : > { %1251 = vmatprep.subr.bf16.mxu0 %v4841_v43  ;;  %1276 = vmatprep.subr.bf16.mxu1 %v4845_v56  ;;  %v4876_v43 = vld [vmem:[%s6364_s2 + $0x1a8] ss:$40 sps:$4 sm:$0xff]   ;;  %v4899_v56 = vld [vmem:[%s6364_s2 + $0x2e4] ss:$40 sps:$4 sm:$0xff]  }
  0x3c   : > { %1252 = vmatpush1.bf16.msra.mxu0 %v4839_v45  ;;  %v4884_v45 = vld [vmem:[%s6364_s2 + $0x1fc] ss:$40 sps:$4 sm:$0xff]  }
  0x3d   : > { %1319 = vmatprep.subr.bf16.mxu0 %v4848_v61  ;;  %v4903_v61 = vld [vmem:[%s6364_s2 + $0x20] ss:$40 sps:$4 sm:$0xff]  }
  0xea   : > { %v4697_v44 = vpop.f32.mrb[0].mxu0 }
  0xeb   : > { %v481_v47 = vrot.slane %v4697_v44, 2  ;;  %v495_v48 = vrot.slane %v4697_v44, 4  ;;  %v461_v49 = vpop.f32.mrb[1].mxu0  ;;  %v488_v50 = vrot.slane %v4697_v44, 3  ;;  %v474_v51 = vrot.slane %v4697_v44, 1 }
  0xec   : > { %v480_v52 = vrot.slane %v461_v49, 2  ;;  %v494_v53 = vrot.slane %v461_v49, 4  ;;  %v487_v54 = vrot.slane %v461_v49, 3  ;;  %v473_v55 = vrot.slane %v461_v49, 1 }
  0xee   : > { %v496_v57 = vsel %vm493_vm1, %v494_v53, %v495_v48  ;;  %v500_v58 = vsel %vm493_vm1, %v495_v48, %v494_v53  ;;  %v489_v59 = vsel %vm486_vm2, %v487_v54, %v488_v50  ;;  %v492_v60 = vsel %vm486_vm2, %v488_v50, %v487_v54  ;;  %v4887_v48 = vld [vmem:[%s6364_s2 + $0x244] ss:$40 sps:$4 sm:$0xff]   ;;  %v4885_v50 = vld [vmem:[%s6364_s2 + $0x240] ss:$40 sps:$4 sm:$0xff]   ;;  %v4891_v54 = vld [vmem:[%s6364_s2 + $0x290] ss:$40 sps:$4 sm:$0xff]  }
  0xef   : > { %v5500_v62 = vpack.c.bf16 %v500_v58, %v496_v57  ;;  %v4778_v63 = vpack.i.bf16 %v492_v60, %v489_v59  ;;  %v475_v0 = vsel %vm472_vm3, %v473_v55, %v474_v51  ;;  %v478_v1 = vsel %vm472_vm3, %v474_v51, %v473_v55  ;;  %v4888_v51 = vld [vmem:[%s6364_s2 + $0x248] ss:$40 sps:$4 sm:$0xff]   ;;  %v4896_v53 = vld [vmem:[%s6364_s2 + $0x29c] ss:$40 sps:$4 sm:$0xff]   ;;  %v4894_v55 = vld [vmem:[%s6364_s2 + $0x298] ss:$40 sps:$4 sm:$0xff]  }
  0xf0   : > { %v4768_v2 = vpack.i.bf16 %v478_v1, %v475_v0  ;;  %v482_v3 = vsel %vm479_vm5, %v480_v52, %v481_v47  ;;  %v485_v4 = vsel %vm479_vm5, %v481_v47, %v480_v52  ;;  %v4882_v47 = vld [vmem:[%s6364_s2 + $0x1f8] ss:$40 sps:$4 sm:$0xff]   ;;  %v4893_v52 = vld [vmem:[%s6364_s2 + $0x294] ss:$40 sps:$4 sm:$0xff]   ;;  %v4900_v59 = vld [vmem:[%s6364_s2 + $0x2e8] ss:$40 sps:$4 sm:$0xff]  }
  0xf1   : > { %4328 = vmatprep.mubr.msk.bf16.mxu1 %vm522_vm4, %v5500_v62  ;;  %4329 = vmatprep.mubr.msk.bf16.mxu0 %vm522_vm4, %v5500_v62  ;;  %v4773_v5 = vpack.i.bf16 %v485_v4, %v482_v3  ;;  %v4902_v57 = vld [vmem:[%s6364_s2 + $0x2ec] ss:$40 sps:$4 sm:$0xff]   ;;  %v4897_v58 = vld [vmem:[%s6364_s2 + $0x2e0] ss:$40 sps:$4 sm:$0xff]   ;;  %v4906_v0 = vld [vmem:[%s6364_s2 + $0x70] ss:$40 sps:$4 sm:$0xff]  }
  0xf2   : > { %4779 = vrot.lane.b32.xlu1 %v4778_v63, %s5268_s13  ;;  %4769 = vrot.lane.b32.xlu0 %v4768_v2, %s5269_s14  ;;  %v4905_v60 = vld [vmem:[%s6364_s2 + $0x24] ss:$40 sps:$4 sm:$0xff]   ;;  %v4908_v63 = vld [vmem:[%s6364_s2 + $0x74] ss:$40 sps:$4 sm:$0xff]   ;;  %vm1735_vm1 = vcmask 1045509   ;;  %vm1737_vm2 = vcmask 1047559  }
  0xf3   : > { %v4911_v1 = vld [vmem:[%s6364_s2 + $0xc4] ss:$40 sps:$4 sm:$0xff]   ;;  %v4909_v2 = vld [vmem:[%s6364_s2 + $0xc0] ss:$40 sps:$4 sm:$0xff]   ;;  %v4914_v3 = vld [vmem:[%s6364_s2 + $0x114] ss:$40 sps:$4 sm:$0xff]  }
  0xf4   : > { %v4917_v4 = vld [vmem:[%s6364_s2 + $0x164] ss:$40 sps:$4 sm:$0xff]  }
  0xf6   : > { %4774 = vrot.lane.b32.xlu0 %v4773_v5, %s5270_s15  ;;  %v4915_v5 = vld [vmem:[%s6364_s2 + $0x160] ss:$40 sps:$4 sm:$0xff]  }
 0x164   : > { %v4770_v6 = vpop.permute.xlu0 %4769  ;;  %v4780_v9 = vpop.permute.xlu1 %4779 }
 0x165   : > { %v4772_v7 = vunpack.i.h.bf16 %v4770_v6  ;;  %v4771_v8 = vunpack.i.l.bf16 %v4770_v6  ;;  %v4782_v13 = vunpack.i.h.bf16 %v4780_v9  ;;  %v4781_v14 = vunpack.i.l.bf16 %v4780_v9  ;;  %v4920_v6 = vld [vmem:[%s6364_s2 + $0x1b4] ss:$40 sps:$4 sm:$0xff]   ;;  %v4921_v9 = vld [vmem:[%s6364_s2 + $0x200] ss:$40 sps:$4 sm:$0xff]  }
 0x167   : > { %v524_v15 = vsel %vm522_vm4, %v4697_v44, %v4772_v7  ;;  %v523_v16 = vsel %vm522_vm4, %v461_v49, %v4771_v8  ;;  %v4881_v44 = vld [vmem:[%s6364_s2 + $0x1f4] ss:$40 sps:$4 sm:$0xff]   ;;  %v4918_v7 = vld [vmem:[%s6364_s2 + $0x1b0] ss:$40 sps:$4 sm:$0xff]   ;;  %v4923_v8 = vld [vmem:[%s6364_s2 + $0x204] ss:$40 sps:$4 sm:$0xff]  }
 0x168   : > { %v4775_v10 = vpop.permute.xlu0 %4774  ;;  %v4890_v49 = vld [vmem:[%s6364_s2 + $0x24c] ss:$40 sps:$4 sm:$0xff]  }
 0x169   : > { %v4777_v11 = vunpack.i.h.bf16 %v4775_v10  ;;  %v4776_v12 = vunpack.i.l.bf16 %v4775_v10  ;;  %v4926_v10 = vld [vmem:[%s6364_s2 + $0x254] ss:$40 sps:$4 sm:$0xff]  }
 0x16b   : > { %v526_v17 = vsel %vm525_vm6, %v523_v16, %v4776_v12  ;;  %v527_v18 = vsel %vm525_vm6, %v524_v15, %v4777_v11  ;;  %v4924_v11 = vld [vmem:[%s6364_s2 + $0x250] ss:$40 sps:$4 sm:$0xff]   ;;  %v4929_v12 = vld [vmem:[%s6364_s2 + $0x2a4] ss:$40 sps:$4 sm:$0xff]  }
 0x16c   : > { %v529_v19 = vsel %vm528_vm7, %v526_v17, %v4781_v14  ;;  %v530_v20 = vsel %vm528_vm7, %v527_v18, %v4782_v13  ;;  %v4927_v13 = vld [vmem:[%s6364_s2 + $0x2a0] ss:$40 sps:$4 sm:$0xff]   ;;  %v4932_v14 = vld [vmem:[%s6364_s2 + $0x2f4] ss:$40 sps:$4 sm:$0xff]   ;;  %v4930_v15 = vld [vmem:[%s6364_s2 + $0x2f0] ss:$40 sps:$4 sm:$0xff]   ;;  %v637_v17 = vlaneseq }
 0x16d   : > { %v5516_v23 = vpack.c.bf16 %v530_v20, %v529_v19  ;;  %v5271_v18 = vmov 0.0  }
 0x16e   : > { %1829 = vst [vmem:[#allocation4] sm:$0xff] %v5271_v18  ;;  %1830 = vst [vmem:[#allocation4 + $0x8] sm:$0xff] %v5271_v18  ;;  %v5703_v19 = vshrl.u32 %v637_v17, 7 }
 0x16f   : > { %1223 = vmatmul.mubr.bf16.vlgmr.msra.gmra.mrb[0].mxu1 %v5516_v23  ;;  %1266 = vmatmul.mubr.bf16.vlgmr.msra.gmra.mrb[4].mxu0 %v5516_v23  ;;  %1831 = vst.msk [vmem:[#allocation4 + $0x10] sm:$0xf] %vm5697_vm10, %v5271_v18 }
 0x170   : > { %1277 = vmatpush1.bf16.msra.mxu1 %v4843_v21  ;;  %1320 = vmatpush1.bf16.msra.mxu0 %v4846_v22  ;;  %v5706_v20 = vsub.s32 0, %v5703_v19  ;;  %v5711_v21 = vld [vmem:[%s6366_s4] sm:$0xff]  ;;  %v647_v22 = vsub.s32 2, %v5703_v19 }
 0x171   : > { %4330 = vmatprep.mubr.msk.bf16.mxu1 %vm522_vm4, %v5500_v62  ;;  %4331 = vmatprep.mubr.msk.bf16.mxu0 %vm522_vm4, %v5500_v62 }
 0x172   : > { %1278 = vmatprep.subr.bf16.mxu1 %v4851_v24  ;;  %1321 = vmatprep.subr.bf16.mxu0 %v4854_v25  ;;  %v5720_v24 = vsub.s32 1, %v5703_v19  ;;  %v5272_v25 = vmov 1983009808  }
 0x174   : > { %1279 = vmatpush1.bf16.msra.mxu1 %v4849_v26  ;;  %1322 = vmatpush1.bf16.msra.mxu0 %v4852_v27  ;;  %v1645_v26 = vunpack.c.l.s4 %v5272_v25  ;;  %v651_v27 = vsub.s32 3, %v5703_v19 }
 0x175   : > { %1280 = vmatprep.subr.bf16.mxu1 %v4857_v28  ;;  %1323 = vmatprep.subr.bf16.mxu0 %v4860_v29  ;;  %v1432_v28 = vrot.slane %v5711_v21, %v5706_v20 }
 0x177   : > { %vm5736_vm11 = vcmp.lt.s32.totalorder %v5703_v19, %v1432_v28 }
 0x178   : > { %1281 = vmatpush1.bf16.msra.mxu1 %v4855_v30  ;;  %1324 = vmatpush1.bf16.msra.mxu0 %v4858_v31  ;;  %v1440_v31 = vrot.slane %v5711_v21, %v647_v22 }
 0x179   : > { %1282 = vmatprep.subr.bf16.mxu1 %v4863_v32  ;;  %1325 = vmatprep.subr.bf16.mxu0 %v4866_v33  ;;  %v1436_v32 = vrot.slane %v5711_v21, %v5720_v24 }
 0x17a   : > { %vm1471_vm12 = vcmp.lt.s32.totalorder %v5703_v19, %v1440_v31 }
 0x17b   : > { %vm5742_vm13 = vcmp.lt.s32.totalorder %v5703_v19, %v1436_v32 }
 0x17c   : > { %1283 = vmatpush1.bf16.msra.mxu1 %v4861_v34  ;;  %1326 = vmatpush1.bf16.msra.mxu0 %v4864_v35  ;;  %v1646_v34 = vunpack.c.0.s8 %v1645_v26 }
 0x17d   : > { %1284 = vmatprep.subr.bf16.mxu1 %v4869_v36  ;;  %1327 = vmatprep.subr.bf16.mxu0 %v4872_v37  ;;  %v1444_v36 = vrot.slane %v5711_v21, %v651_v27 }
 0x17f   : > { %vm1472_vm14 = vcmp.lt.s32.totalorder %v5703_v19, %v1444_v36 }
 0x180   : > { %1285 = vmatpush1.bf16.msra.mxu1 %v4867_v38  ;;  %1328 = vmatpush1.bf16.msra.mxu0 %v4870_v39 }
 0x181   : > { %1286 = vmatprep.subr.bf16.mxu1 %v4875_v40  ;;  %1329 = vmatprep.subr.bf16.mxu0 %v4878_v41 }
 0x184   : > { %1287 = vmatpush1.bf16.msra.mxu1 %v4873_v42  ;;  %1330 = vmatpush1.bf16.msra.mxu0 %v4876_v43 }
 0x185   : > { %1288 = vmatprep.subr.bf16.mxu1 %v4881_v44  ;;  %1331 = vmatprep.subr.bf16.mxu0 %v4884_v45 }
 0x188   : > { %1289 = vmatpush1.bf16.msra.mxu1 %v4879_v46  ;;  %1332 = vmatpush1.bf16.msra.mxu0 %v4882_v47  ;;  %v5747_v46 = vsub.s32 %v1646_v34, %v5703_v19 }
 0x189   : > { %1290 = vmatprep.subr.bf16.mxu1 %v4887_v48  ;;  %1333 = vmatprep.subr.bf16.mxu0 %v4890_v49 }
 0x18c   : > { %1291 = vmatpush1.bf16.msra.mxu1 %v4885_v50  ;;  %1334 = vmatpush1.bf16.msra.mxu0 %v4888_v51 }
 0x18d   : > { %1292 = vmatprep.subr.bf16.mxu1 %v4893_v52  ;;  %1335 = vmatprep.subr.bf16.mxu0 %v4896_v53 }
 0x190   : > { %1293 = vmatpush1.bf16.msra.mxu1 %v4891_v54  ;;  %1336 = vmatpush1.bf16.msra.mxu0 %v4894_v55 }
 0x191   : > { %1294 = vmatprep.subr.bf16.mxu1 %v4899_v56  ;;  %1337 = vmatprep.subr.bf16.mxu0 %v4902_v57 }
 0x194   : > { %1295 = vmatpush1.bf16.msra.mxu1 %v4897_v58  ;;  %1338 = vmatpush1.bf16.msra.mxu0 %v4900_v59 }
 0x195   : > { %1362 = vmatprep.subr.bf16.mxu1 %v4905_v60 }
 0x197   : > { %1309 = vmatmul.mubr.bf16.vlgmr.msra.gmra.mrb[4].mxu1 %v5516_v23  ;;  %1352 = vmatmul.mubr.bf16.vlgmr.msra.gmra.mrb[8].mxu0 %v5516_v23 }
 0x198   : > { %1363 = vmatpush1.bf16.msra.mxu1 %v4903_v61  ;;  %4332 = vmatprep.mubr.msk.bf16.mxu1 %vm522_vm4, %v5500_v62  ;;  %v4912_v62 = vld [vmem:[%s6364_s2 + $0x110] ss:$40 sps:$4 sm:$0xff]  }
 0x199   : > { %1364 = vmatprep.subr.bf16.mxu1 %v4908_v63 }
 0x19c   : > { %1365 = vmatpush1.bf16.msra.mxu1 %v4906_v0 }
 0x19d   : > { %1366 = vmatprep.subr.bf16.mxu1 %v4911_v1 }
 0x1a0   : > { %1367 = vmatpush1.bf16.msra.mxu1 %v4909_v2 }
 0x1a1   : > { %1368 = vmatprep.subr.bf16.mxu1 %v4914_v3 }
 0x1a4   : > { %1369 = vmatpush1.bf16.msra.mxu1 %v4912_v62 }
 0x1a5   : > { %1370 = vmatprep.subr.bf16.mxu1 %v4917_v4 }
 0x1a8   : > { %1371 = vmatpush1.bf16.msra.mxu1 %v4915_v5 }
 0x1a9   : > { %1372 = vmatprep.subr.bf16.mxu1 %v4920_v6 }
 0x1ac   : > { %1373 = vmatpush1.bf16.msra.mxu1 %v4918_v7 }
 0x1ad   : > { %1374 = vmatprep.subr.bf16.mxu1 %v4923_v8 }
 0x1b0   : > { %1375 = vmatpush1.bf16.msra.mxu1 %v4921_v9 }
 0x1b1   : > { %1376 = vmatprep.subr.bf16.mxu1 %v4926_v10 }
 0x1b4   : > { %1377 = vmatpush1.bf16.msra.mxu1 %v4924_v11 }
 0x1b5   : > { %1378 = vmatprep.subr.bf16.mxu1 %v4929_v12 }
 0x1b8   : > { %1379 = vmatpush1.bf16.msra.mxu1 %v4927_v13 }
 0x1b9   : > { %1380 = vmatprep.subr.bf16.mxu1 %v4932_v14 }
 0x1bc   : > { %1381 = vmatpush1.bf16.msra.mxu1 %v4930_v15 }
 0x1bf   : > { %1395 = vmatmul.mubr.bf16.vlgmr.msra.gmra.mrb[8].mxu1 %v5516_v23  ;;  %v5717_v23 = vld [vmem:[%s6365_s3] sm:$0xff] }
 0x1c0   : > { %v640_v29 = vrot.slane %v5717_v23, %v5706_v20  ;;  %v648_v30 = vrot.slane %v5717_v23, %v647_v22  ;;  %v644_v33 = vrot.slane %v5717_v23, %v5720_v24  ;;  %v652_v35 = vrot.slane %v5717_v23, %v651_v27 }
 0x242   : > { %v1224_v37 = vpop.f32.mrb[0].mxu1  ;;  %v1267_v39 = vpop.f32.mrb[4].mxu0 }
 0x243   : > { %v1225_v40 = vadd.f32 %v1224_v37, %v640_v29  ;;  %v1268_v41 = vadd.f32 %v1267_v39, %v648_v30  ;;  %v1226_v42 = vpop.f32.mrb[1].mxu1  ;;  %v1269_v44 = vpop.f32.mrb[5].mxu0 }
 0x244   : > { %v1227_v45 = vadd.f32 %v1226_v42, %v644_v33  ;;  %v1270_v47 = vadd.f32 %v1269_v44, %v652_v35  ;;  %v1228_v48 = vpop.f32.mrb[2].mxu1  ;;  %v1271_v49 = vpop.f32.mrb[6].mxu0 }
 0x245   : > { %v1405_v50 = vmax.f32 %v1225_v40, 0.0  ;;  %v1407_v51 = vmax.f32 %v1268_v41, 0.0  ;;  %v1229_v52 = vadd.f32 %v1228_v48, %v640_v29  ;;  %v1272_v53 = vadd.f32 %v1271_v49, %v648_v30  ;;  %v1230_v54 = vpop.f32.mrb[3].mxu1  ;;  %v1273_v55 = vpop.f32.mrb[7].mxu0 }
 0x246   : > { %v1406_v56 = vmax.f32 %v1227_v45, 0.0  ;;  %v1408_v57 = vmax.f32 %v1270_v47, 0.0  ;;  %v1231_v58 = vadd.f32 %v1230_v54, %v644_v33  ;;  %v1274_v59 = vadd.f32 %v1273_v55, %v652_v35 }
 0x247   : > { %v1479_v60 = vsel %vm5736_vm11, %v1405_v50, 0.0  ;;  %v1481_v61 = vsel %vm1471_vm12, %v1407_v51, 0.0  ;;  %v1415_v63 = vmax.f32 %v1229_v52, 0.0  ;;  %v1417_v0 = vmax.f32 %v1272_v53, 0.0 }
 0x248   : > { %v1499_v1 = vrot.slane %v1479_v60, 4  ;;  %v1511_v2 = vrot.slane %v1481_v61, 4  ;;  %v1480_v3 = vsel %vm5742_vm13, %v1406_v56, 0.0  ;;  %v1482_v62 = vsel %vm1472_vm14, %v1408_v57, 0.0 }
 0x249   : > { %v1505_v4 = vrot.slane %v1480_v3, 4  ;;  %v1517_v5 = vrot.slane %v1482_v62, 4  ;;  %v1489_v6 = vsel %vm5736_vm11, %v1415_v63, 0.0  ;;  %v1491_v7 = vsel %vm1471_vm12, %v1417_v0, 0.0 }
 0x24a   : > { %v1500_v8 = vmax.f32 %v1479_v60, %v1499_v1  ;;  %v1512_v9 = vmax.f32 %v1481_v61, %v1511_v2  ;;  %v1561_v10 = vrot.slane %v1489_v6, 4  ;;  %v1573_v11 = vrot.slane %v1491_v7, 4 }
 0x24b   : > { %v1506_v12 = vmax.f32 %v1480_v3, %v1505_v4  ;;  %v1518_v13 = vmax.f32 %v1482_v62, %v1517_v5  ;;  %v1416_v14 = vmax.f32 %v1231_v58, 0.0  ;;  %v1418_v15 = vmax.f32 %v1274_v59, 0.0 }
 0x24c   : > { %v1501_v17 = vrot.slane %v1500_v8, 2  ;;  %v1513_v18 = vrot.slane %v1512_v9, 2  ;;  %v1562_v22 = vmax.f32 %v1489_v6, %v1561_v10  ;;  %v1574_v25 = vmax.f32 %v1491_v7, %v1573_v11 }
 0x24d   : > { %v1507_v26 = vrot.slane %v1506_v12, 2  ;;  %v1519_v27 = vrot.slane %v1518_v13, 2  ;;  %v1490_v28 = vsel %vm5742_vm13, %v1416_v14, 0.0  ;;  %v1492_v29 = vsel %vm1472_vm14, %v1418_v15, 0.0 }
 0x24e   : > { %v1502_v30 = vmax.f32 %v1500_v8, %v1501_v17  ;;  %v1514_v31 = vmax.f32 %v1512_v9, %v1513_v18  ;;  %v1563_v32 = vrot.slane %v1562_v22, 2  ;;  %v1575_v33 = vrot.slane %v1574_v25, 2 }
 0x24f   : > { %v1508_v34 = vmax.f32 %v1506_v12, %v1507_v26  ;;  %v1520_v35 = vmax.f32 %v1518_v13, %v1519_v27  ;;  %v1567_v37 = vrot.slane %v1490_v28, 4  ;;  %v1579_v38 = vrot.slane %v1492_v29, 4 }
 0x250   : > { %v1503_v39 = vrot.slane %v1502_v30, 1  ;;  %v1515_v40 = vrot.slane %v1514_v31, 1  ;;  %v1564_v41 = vmax.f32 %v1562_v22, %v1563_v32  ;;  %v1576_v42 = vmax.f32 %v1574_v25, %v1575_v33 }
 0x251   : > { %v1509_v44 = vrot.slane %v1508_v34, 1  ;;  %v1521_v45 = vrot.slane %v1520_v35, 1  ;;  %v1568_v47 = vmax.f32 %v1490_v28, %v1567_v37  ;;  %v1580_v43 = vmax.f32 %v1492_v29, %v1579_v38 }
 0x252   : > { %v1504_v48 = vmax.f32 %v1502_v30, %v1503_v39  ;;  %v1516_v49 = vmax.f32 %v1514_v31, %v1515_v40  ;;  %v1565_v36 = vrot.slane %v1564_v41, 1  ;;  %v1577_v50 = vrot.slane %v1576_v42, 1 }
 0x253   : > { %v1510_v51 = vmax.f32 %v1508_v34, %v1509_v44  ;;  %v1522_v52 = vmax.f32 %v1520_v35, %v1521_v45  ;;  %v1569_v53 = vrot.slane %v1568_v47, 2  ;;  %v1581_v54 = vrot.slane %v1580_v43, 2 }
 0x254   : > { %v1566_v55 = vmax.f32 %v1564_v41, %v1565_v36  ;;  %v1578_v56 = vmax.f32 %v1576_v42, %v1577_v50  ;;  %v655_v18 = vsub.s32 4, %v5703_v19  ;;  %v663_v22 = vsub.s32 6, %v5703_v19 }
 0x255   : > { %v1642_v57 = vcombine.low %v1504_v48, %v1510_v51  ;;  %v1643_v58 = vcombine.low %v1516_v49, %v1522_v52  ;;  %v1570_v59 = vmax.f32 %v1568_v47, %v1569_v53  ;;  %v1582_v60 = vmax.f32 %v1580_v43, %v1581_v54 }
 0x256   : > { %v1762_v61 = vsel %vm1731_vm15, %v1566_v55, %v1504_v48  ;;  %v1764_v63 = vsel %vm1731_vm15, %v1578_v56, %v1516_v49  ;;  %v659_v26 = vsub.s32 5, %v5703_v19  ;;  %v667_v27 = vsub.s32 7, %v5703_v19 }
 0x257   : > { %v1650_v0 = vrot.slane %v1642_v57, %v5747_v46  ;;  %v1657_v1 = vrot.slane %v1643_v58, %v5747_v46  ;;  %v1571_v2 = vrot.slane %v1570_v59, 1  ;;  %v1583_v3 = vrot.slane %v1582_v60, 1 }
 0x258   : > { %v656_v30 = vrot.slane %v5717_v23, %v655_v18  ;;  %v1448_v31 = vrot.slane %v5711_v21, %v655_v18  ;;  %v664_v32 = vrot.slane %v5717_v23, %v663_v22  ;;  %v1456_v33 = vrot.slane %v5711_v21, %v663_v22 }
 0x259   : > { %v1658_v62 = vcombine.low %v1650_v0, %v1657_v1  ;;  %v1572_v4 = vmax.f32 %v1570_v59, %v1571_v2  ;;  %v1584_v5 = vmax.f32 %v1582_v60, %v1583_v3  ;;  %v660_v34 = vrot.slane %v5717_v23, %v659_v26 }
 0x25a   : > { %v1452_v35 = vrot.slane %v5711_v21, %v659_v26  ;;  %v668_v37 = vrot.slane %v5717_v23, %v667_v27  ;;  %v1460_v38 = vrot.slane %v5711_v21, %v667_v27  ;;  %vm1473_vm3 = vcmp.lt.s32.totalorder %v5703_v19, %v1448_v31 }
 0x25b   : > { %v1684_v6 = vcombine.low %v1566_v55, %v1572_v4  ;;  %v1763_v7 = vsel %vm1731_vm15, %v1572_v4, %v1510_v51  ;;  %v1685_v8 = vcombine.low %v1578_v56, %v1584_v5  ;;  %v1765_v9 = vsel %vm1731_vm15, %v1584_v5, %v1522_v52 }
 0x25c   : > { %v1774_v10 = vcombine.low %v1762_v61, %v1763_v7  ;;  %v1784_v11 = vcombine.low %v1764_v63, %v1765_v9  ;;  %vm1475_vm4 = vcmp.lt.s32.totalorder %v5703_v19, %v1456_v33  ;;  %vm1474_vm5 = vcmp.lt.s32.totalorder %v5703_v19, %v1452_v35 }
 0x25d   : > { %v1692_v12 = vrot.slane %v1684_v6, %v5747_v46  ;;  %v1699_v13 = vrot.slane %v1685_v8, %v5747_v46  ;;  %vm1476_vm6 = vcmp.lt.s32.totalorder %v5703_v19, %v1460_v38 }
 0x25e   : > { %4333 = vst.sshfl [vmem:[#allocation2] sm:$0x33 pattern:$0x76325410] %v1774_v10 }
 0x25f   : > { %4334 = vst.sshfl [vmem:[#allocation2 + $0x4] sm:$0x33 pattern:$0x76325410] %v1784_v11  ;;  %v1700_v14 = vcombine.low %v1692_v12, %v1699_v13 }
 0x261   : > { %v1730_v15 = vrot.slane %v1700_v14, 7 }
 0x263   : > { %v1732_v17 = vsel %vm1731_vm15, %v1730_v15, %v1658_v62 }
 0x264   : > { %v1734_v25 = vsel %vm1733_vm0, %v1730_v15, %v1732_v17 }
 0x265   : > { %v1736_v28 = vsel %vm1735_vm1, %v1730_v15, %v1734_v25 }
 0x266   : > { %v1738_v29 = vsel %vm1737_vm2, %v1730_v15, %v1736_v28 }
 0x267   : > { %1756 = vst [vmem:[#allocation3] sm:$0xff] %v1738_v29 }
 0x26a   : > { %v1310_v39 = vpop.f32.mrb[4].mxu1  ;;  %v1353_v40 = vpop.f32.mrb[8].mxu0 }
 0x26b   : > { %v1311_v41 = vadd.f32 %v1310_v39, %v656_v30  ;;  %v1354_v42 = vadd.f32 %v1353_v40, %v664_v32  ;;  %v1312_v44 = vpop.f32.mrb[5].mxu1  ;;  %v1355_v45 = vpop.f32.mrb[9].mxu0 }
 0x26c   : > { %v1313_v47 = vadd.f32 %v1312_v44, %v660_v34  ;;  %v1356_v43 = vadd.f32 %v1355_v45, %v668_v37  ;;  %v1314_v48 = vpop.f32.mrb[6].mxu1  ;;  %v1357_v23 = vpop.f32.mrb[10].mxu0 }
 0x26d   : > { %v1409_v49 = vmax.f32 %v1311_v41, 0.0  ;;  %v1411_v21 = vmax.f32 %v1354_v42, 0.0  ;;  %v1315_v36 = vadd.f32 %v1314_v48, %v656_v30  ;;  %v1358_v50 = vadd.f32 %v1357_v23, %v664_v32  ;;  %v1316_v51 = vpop.f32.mrb[7].mxu1  ;;  %v1359_v52 = vpop.f32.mrb[11].mxu0 }
 0x26e   : > { %v1410_v53 = vmax.f32 %v1313_v47, 0.0  ;;  %v1412_v54 = vmax.f32 %v1356_v43, 0.0  ;;  %v1317_v55 = vadd.f32 %v1316_v51, %v660_v34  ;;  %v1360_v56 = vadd.f32 %v1359_v52, %v668_v37 }
 0x26f   : > { %v1483_v57 = vsel %vm1473_vm3, %v1409_v49, 0.0  ;;  %v1485_v58 = vsel %vm1475_vm4, %v1411_v21, 0.0  ;;  %v1419_v59 = vmax.f32 %v1315_v36, 0.0  ;;  %v1421_v60 = vmax.f32 %v1358_v50, 0.0 }
 0x270   : > { %v1523_v61 = vrot.slane %v1483_v57, 4  ;;  %v1535_v63 = vrot.slane %v1485_v58, 4  ;;  %v1484_v0 = vsel %vm1474_vm5, %v1410_v53, 0.0  ;;  %v1486_v1 = vsel %vm1476_vm6, %v1412_v54, 0.0 }
 0x271   : > { %v1529_v2 = vrot.slane %v1484_v0, 4  ;;  %v1541_v3 = vrot.slane %v1486_v1, 4  ;;  %v1493_v62 = vsel %vm1473_vm3, %v1419_v59, 0.0  ;;  %v1495_v4 = vsel %vm1475_vm4, %v1421_v60, 0.0 }
 0x272   : > { %v1524_v5 = vmax.f32 %v1483_v57, %v1523_v61  ;;  %v1536_v6 = vmax.f32 %v1485_v58, %v1535_v63  ;;  %v1585_v7 = vrot.slane %v1493_v62, 4  ;;  %v1597_v8 = vrot.slane %v1495_v4, 4 }
 0x273   : > { %v1530_v9 = vmax.f32 %v1484_v0, %v1529_v2  ;;  %v1542_v10 = vmax.f32 %v1486_v1, %v1541_v3  ;;  %v1420_v11 = vmax.f32 %v1317_v55, 0.0  ;;  %v1422_v12 = vmax.f32 %v1360_v56, 0.0 }
 0x274   : > { %v1525_v13 = vrot.slane %v1524_v5, 2  ;;  %v1537_v14 = vrot.slane %v1536_v6, 2  ;;  %v1586_v15 = vmax.f32 %v1493_v62, %v1585_v7  ;;  %v1598_v17 = vmax.f32 %v1495_v4, %v1597_v8 }
 0x275   : > { %v1531_v18 = vrot.slane %v1530_v9, 2  ;;  %v1543_v22 = vrot.slane %v1542_v10, 2  ;;  %v1494_v25 = vsel %vm1474_vm5, %v1420_v11, 0.0  ;;  %v1496_v26 = vsel %vm1476_vm6, %v1422_v12, 0.0 }
 0x276   : > { %v1526_v27 = vmax.f32 %v1524_v5, %v1525_v13  ;;  %v1538_v28 = vmax.f32 %v1536_v6, %v1537_v14  ;;  %v1587_v29 = vrot.slane %v1586_v15, 2  ;;  %v1599_v30 = vrot.slane %v1598_v17, 2  ;;  %v634_v13 = vld [vmem:[%s6365_s3 + $0x8] sm:$0x3] }
 0x277   : > { %v1532_v31 = vmax.f32 %v1530_v9, %v1531_v18  ;;  %v1544_v32 = vmax.f32 %v1542_v10, %v1543_v22  ;;  %v1591_v33 = vrot.slane %v1494_v25, 4  ;;  %v1603_v34 = vrot.slane %v1496_v26, 4 }
 0x278   : > { %v1527_v37 = vrot.slane %v1526_v27, 1  ;;  %v1539_v39 = vrot.slane %v1538_v28, 1  ;;  %v1588_v40 = vmax.f32 %v1586_v15, %v1587_v29  ;;  %v1600_v41 = vmax.f32 %v1598_v17, %v1599_v30  ;;  %v1428_v15 = vld [vmem:[%s6366_s4 + $0x8] sm:$0x3] }
 0x279   : > { %v1533_v42 = vrot.slane %v1532_v31, 1  ;;  %v1545_v44 = vrot.slane %v1544_v32, 1  ;;  %v1592_v45 = vmax.f32 %v1494_v25, %v1591_v33  ;;  %v1604_v35 = vmax.f32 %v1496_v26, %v1603_v34 }
 0x27a   : > { %v1528_v47 = vmax.f32 %v1526_v27, %v1527_v37  ;;  %v1540_v43 = vmax.f32 %v1538_v28, %v1539_v39  ;;  %v1589_v38 = vrot.slane %v1588_v40, 1  ;;  %v1601_v48 = vrot.slane %v1600_v41, 1 }
 0x27b   : > { %v1534_v23 = vmax.f32 %v1532_v31, %v1533_v42  ;;  %v1546_v49 = vmax.f32 %v1544_v32, %v1545_v44  ;;  %v1593_v21 = vrot.slane %v1592_v45, 2  ;;  %v1605_v36 = vrot.slane %v1604_v35, 2 }
 0x27c   : > { %v1590_v50 = vmax.f32 %v1588_v40, %v1589_v38  ;;  %v1602_v51 = vmax.f32 %v1600_v41, %v1601_v48  ;;  %v672_v18 = vrot.slane %v634_v13, %v5706_v20  ;;  %v1464_v22 = vrot.slane %v1428_v15, %v5706_v20 }
 0x27d   : > { %v1659_v52 = vcombine.low %v1528_v47, %v1534_v23  ;;  %v1660_v53 = vcombine.low %v1540_v43, %v1546_v49  ;;  %v1594_v54 = vmax.f32 %v1592_v45, %v1593_v21  ;;  %v1606_v55 = vmax.f32 %v1604_v35, %v1605_v36 }
 0x27e   : > { %v1766_v56 = vsel %vm1731_vm15, %v1590_v50, %v1528_v47  ;;  %v1768_v57 = vsel %vm1731_vm15, %v1602_v51, %v1540_v43  ;;  %v676_v25 = vrot.slane %v634_v13, %v5720_v24  ;;  %v1468_v26 = vrot.slane %v1428_v15, %v5720_v24 }
 0x27f   : > { %v1667_v58 = vrot.slane %v1659_v52, %v5747_v46  ;;  %v1674_v59 = vrot.slane %v1660_v53, %v5747_v46  ;;  %v1595_v60 = vrot.slane %v1594_v54, 1  ;;  %v1607_v61 = vrot.slane %v1606_v55, 1 }
 0x280   : > { %vm5833_vm7 = vcmp.lt.s32.totalorder %v5703_v19, %v1464_v22  ;;  %vm5838_vm8 = vcmp.lt.s32.totalorder %v5703_v19, %v1468_v26 }
 0x281   : > { %v1675_v63 = vcombine.low %v1667_v58, %v1674_v59  ;;  %v1596_v0 = vmax.f32 %v1594_v54, %v1595_v60  ;;  %v1608_v1 = vmax.f32 %v1606_v55, %v1607_v61 }
 0x283   : > { %v1701_v2 = vcombine.low %v1590_v50, %v1596_v0  ;;  %v1767_v3 = vsel %vm1731_vm15, %v1596_v0, %v1534_v23  ;;  %v1702_v62 = vcombine.low %v1602_v51, %v1608_v1  ;;  %v1769_v4 = vsel %vm1731_vm15, %v1608_v1, %v1546_v49 }
 0x284   : > { %v1795_v5 = vcombine.low %v1766_v56, %v1767_v3  ;;  %v1806_v6 = vcombine.low %v1768_v57, %v1769_v4 }
 0x285   : > { %v1709_v7 = vrot.slane %v1701_v2, %v5747_v46  ;;  %v1716_v8 = vrot.slane %v1702_v62, %v5747_v46 }
 0x286   : > { %4335 = vst.sshfl [vmem:[#allocation2 + $0x8] sm:$0x33 pattern:$0x76325410] %v1795_v5 }
 0x287   : > { %4336 = vst.sshfl [vmem:[#allocation2 + $0xc] sm:$0x33 pattern:$0x76325410] %v1806_v6  ;;  %v1717_v9 = vcombine.low %v1709_v7, %v1716_v8 }
 0x289   : > { %v1741_v10 = vrot.slane %v1717_v9, 7 }
 0x28b   : > { %v1742_v11 = vsel %vm1731_vm15, %v1741_v10, %v1675_v63 }
 0x28c   : > { %v1743_v12 = vsel %vm1733_vm0, %v1741_v10, %v1742_v11 }
 0x28d   : > { %v1744_v14 = vsel %vm1735_vm1, %v1741_v10, %v1743_v12 }
 0x28e   : > { %v1745_v17 = vsel %vm1737_vm2, %v1741_v10, %v1744_v14 }
 0x28f   : > { %1757 = vst [vmem:[#allocation3 + $0x8] sm:$0xff] %v1745_v17 }
 0x292   : > { %v1396_v27 = vpop.f32.mrb[8].mxu1 }
 0x293   : > { %v1397_v28 = vadd.f32 %v1396_v27, %v672_v18  ;;  %v1398_v29 = vpop.f32.mrb[9].mxu1 }
 0x294   : > { %v1399_v31 = vadd.f32 %v1398_v29, %v676_v25  ;;  %v1400_v32 = vpop.f32.mrb[10].mxu1 }
 0x295   : > { %v1413_v33 = vmax.f32 %v1397_v28, 0.0  ;;  %v1401_v20 = vadd.f32 %v1400_v32, %v672_v18  ;;  %v1402_v37 = vpop.f32.mrb[11].mxu1 }
 0x296   : > { %v1414_v39 = vmax.f32 %v1399_v31, 0.0  ;;  %v1403_v24 = vadd.f32 %v1402_v37, %v676_v25 }
 0x297   : > { %v1487_v40 = vsel %vm5833_vm7, %v1413_v33, 0.0  ;;  %v1423_v41 = vmax.f32 %v1401_v20, 0.0 }
 0x298   : > { %v1547_v42 = vrot.slane %v1487_v40, 4  ;;  %v1488_v44 = vsel %vm5838_vm8, %v1414_v39, 0.0  ;;  %v1424_v45 = vmax.f32 %v1403_v24, 0.0 }
 0x299   : > { %v1554_v35 = vsel %vm1553_vm9, %v1488_v44, -inf  ;;  %v1497_v19 = vsel %vm5833_vm7, %v1423_v41, 0.0 }
 0x29a   : > { %v1548_v47 = vmax.f32 %v1487_v40, %v1547_v42  ;;  %v1555_v43 = vrot.slane %v1554_v35, 4  ;;  %v1609_v38 = vrot.slane %v1497_v19, 4  ;;  %v1498_v48 = vsel %vm5838_vm8, %v1424_v45, 0.0 }
 0x29b   : > { %v1615_v23 = vsel %vm1553_vm9, %v1498_v48, -inf }
 0x29c   : > { %v1549_v49 = vrot.slane %v1548_v47, 2  ;;  %v1556_v21 = vmax.f32 %v1554_v35, %v1555_v43  ;;  %v1610_v36 = vmax.f32 %v1497_v19, %v1609_v38  ;;  %v1616_v50 = vrot.slane %v1615_v23, 4 }
 0x29e   : > { %v1550_v51 = vmax.f32 %v1548_v47, %v1549_v49  ;;  %v1557_v52 = vrot.slane %v1556_v21, 2  ;;  %v1611_v53 = vrot.slane %v1610_v36, 2  ;;  %v1617_v54 = vmax.f32 %v1615_v23, %v1616_v50 }
 0x2a0   : > { %v1551_v55 = vrot.slane %v1550_v51, 1  ;;  %v1558_v56 = vmax.f32 %v1556_v21, %v1557_v52  ;;  %v1612_v57 = vmax.f32 %v1610_v36, %v1611_v53  ;;  %v1618_v58 = vrot.slane %v1617_v54, 2 }
 0x2a2   : > { %v1559_v59 = vrot.slane %v1558_v56, 1  ;;  %v1613_v60 = vrot.slane %v1612_v57, 1  ;;  %v1619_v61 = vmax.f32 %v1617_v54, %v1618_v58  ;;  %v1552_v63 = vmax.f32 %v1550_v51, %v1551_v55 }
 0x2a4   : > { %v1560_v0 = vmax.f32 %v1558_v56, %v1559_v59  ;;  %v1614_v1 = vmax.f32 %v1612_v57, %v1613_v60  ;;  %v1620_v2 = vrot.slane %v1619_v61, 1 }
 0x2a6   : > { %v1676_v3 = vcombine.low %v1552_v63, %v1560_v0  ;;  %v1770_v62 = vsel %vm1731_vm15, %v1614_v1, %v1552_v63  ;;  %v1621_v4 = vmax.f32 %v1619_v61, %v1620_v2 }
 0x2a8   : > { %v1718_v5 = vcombine.low %v1614_v1, %v1621_v4  ;;  %v1771_v6 = vsel %vm1731_vm15, %v1621_v4, %v1560_v0  ;;  %v1683_v10 = vrot.slane %v1676_v3, %v5747_v46 }
 0x2a9   : > { %v1773_v7 = vsel %vm1553_vm9, %v1771_v6, 0.0 }
 0x2aa   : > { %v1725_v8 = vrot.slane %v1718_v5, %v5747_v46  ;;  %v1818_v9 = vcombine.low %v1770_v62, %v1773_v7 }
 0x2ac   : > { %v1748_v11 = vrot.slane %v1725_v8, 7  ;;  %4337 = vst.sshfl [vmem:[#allocation2 + $0x10] sm:$0x33 pattern:$0x76325410] %v1818_v9 }
 0x2ae   : > { %v1749_v12 = vsel %vm1731_vm15, %v1748_v11, %v1683_v10 }
 0x2af   : > { %v1750_v13 = vsel %vm1733_vm0, %v1748_v11, %v1749_v12 }
 0x2b0   : > { %v1751_v14 = vsel %vm1735_vm1, %v1748_v11, %v1750_v13 }
 0x2b1   : > { %v1752_v15 = vsel %vm1737_vm2, %v1748_v11, %v1751_v14 }
 0x2b2   : > { %1761 = vst.msk [vmem:[#allocation3 + $0x10] sm:$0xf] %vm5697_vm10, %v1752_v15 }
 0x2b3 PF: > { %v4933_v46 = vld [vmem:[%s5355_s24 + $0x4] ss:$40 sps:$4 sm:$0xff]   ;;  %v4937_v18 = vld [vmem:[%s5355_s24] ss:$40 sps:$4 sm:$0xff]   ;;  %v4939_v16 = vld [vmem:[%s5355_s24 + $0x54] ss:$40 sps:$4 sm:$0xff]  }
 0x2b4   : > { %v4935_v17 = vld [vmem:[%s5355_s24 + $0xc] ss:$40 sps:$4 sm:$0xff]   ;;  %2812 = vmatprep.subr.bf16.mxu0 %v4933_v46  ;;  %v4938_v22 = vld [vmem:[%s5355_s24 + $0x8] ss:$40 sps:$4 sm:$0xff]   ;;  %v4941_v25 = vld [vmem:[%s5355_s24 + $0x5c] ss:$40 sps:$4 sm:$0xff]  }
 0x2b5   : > { %2853 = vmatprep.subr.bf16.mxu1 %v4935_v17  ;;  %2813 = vmatpush1.bf16.msra.mxu0 %v4937_v18  ;;  %v4943_v26 = vld [vmem:[%s5355_s24 + $0x50] ss:$40 sps:$4 sm:$0xff]   ;;  %v4945_v28 = vld [vmem:[%s5355_s24 + $0xa4] ss:$40 sps:$4 sm:$0xff]   ;;  %v4949_v30 = vld [vmem:[%s5355_s24 + $0xa0] ss:$40 sps:$4 sm:$0xff]  }
 0x2b6   : > { %2854 = vmatpush1.bf16.msra.mxu1 %v4938_v22  ;;  %2814 = vmatprep.subr.bf16.mxu0 %v4939_v16  ;;  %v4944_v27 = vld [vmem:[%s5355_s24 + $0x58] ss:$40 sps:$4 sm:$0xff]   ;;  %v4947_v29 = vld [vmem:[%s5355_s24 + $0xac] ss:$40 sps:$4 sm:$0xff]   ;;  %v4950_v31 = vld [vmem:[%s5355_s24 + $0xa8] ss:$40 sps:$4 sm:$0xff]  }
 0x2b7   : > { %2855 = vmatprep.subr.bf16.mxu1 %v4941_v25  ;;  %v4951_v32 = vld [vmem:[%s5355_s24 + $0xf4] ss:$40 sps:$4 sm:$0xff]   ;;  %v4955_v34 = vld [vmem:[%s5355_s24 + $0xf0] ss:$40 sps:$4 sm:$0xff]   ;;  %v4957_v37 = vld [vmem:[%s5355_s24 + $0x144] ss:$40 sps:$4 sm:$0xff]  }
 0x2b8   : > { %v4953_v33 = vld [vmem:[%s5355_s24 + $0xfc] ss:$40 sps:$4 sm:$0xff]   ;;  %v4956_v20 = vld [vmem:[%s5355_s24 + $0xf8] ss:$40 sps:$4 sm:$0xff]   ;;  %v4959_v39 = vld [vmem:[%s5355_s24 + $0x14c] ss:$40 sps:$4 sm:$0xff]  }
 0x2b9   : > { %2815 = vmatpush1.bf16.msra.mxu0 %v4943_v26  ;;  %v4961_v24 = vld [vmem:[%s5355_s24 + $0x140] ss:$40 sps:$4 sm:$0xff]   ;;  %v4963_v41 = vld [vmem:[%s5355_s24 + $0x194] ss:$40 sps:$4 sm:$0xff]   ;;  %v4967_v44 = vld [vmem:[%s5355_s24 + $0x190] ss:$40 sps:$4 sm:$0xff]  }
 0x2ba   : > { %2856 = vmatpush1.bf16.msra.mxu1 %v4944_v27  ;;  %2816 = vmatprep.subr.bf16.mxu0 %v4945_v28  ;;  %v4962_v40 = vld [vmem:[%s5355_s24 + $0x148] ss:$40 sps:$4 sm:$0xff]   ;;  %v4965_v42 = vld [vmem:[%s5355_s24 + $0x19c] ss:$40 sps:$4 sm:$0xff]   ;;  %v4968_v45 = vld [vmem:[%s5355_s24 + $0x198] ss:$40 sps:$4 sm:$0xff]  }
 0x2bb   : > { %2857 = vmatprep.subr.bf16.mxu1 %v4947_v29  ;;  %v4969_v35 = vld [vmem:[%s5355_s24 + $0x1e4] ss:$40 sps:$4 sm:$0xff]   ;;  %v4973_v47 = vld [vmem:[%s5355_s24 + $0x1e0] ss:$40 sps:$4 sm:$0xff]   ;;  %v4975_v38 = vld [vmem:[%s5355_s24 + $0x234] ss:$40 sps:$4 sm:$0xff]  }
 0x2bc   : > { %v4971_v19 = vld [vmem:[%s5355_s24 + $0x1ec] ss:$40 sps:$4 sm:$0xff]   ;;  %v4974_v43 = vld [vmem:[%s5355_s24 + $0x1e8] ss:$40 sps:$4 sm:$0xff]   ;;  %v4977_v48 = vld [vmem:[%s5355_s24 + $0x23c] ss:$40 sps:$4 sm:$0xff]  }
 0x2bd   : > { %2817 = vmatpush1.bf16.msra.mxu0 %v4949_v30  ;;  %v4979_v23 = vld [vmem:[%s5355_s24 + $0x230] ss:$40 sps:$4 sm:$0xff]   ;;  %v4981_v21 = vld [vmem:[%s5355_s24 + $0x284] ss:$40 sps:$4 sm:$0xff]   ;;  %v4985_v50 = vld [vmem:[%s5355_s24 + $0x280] ss:$40 sps:$4 sm:$0xff]  }
 0x2be   : > { %2858 = vmatpush1.bf16.msra.mxu1 %v4950_v31  ;;  %2818 = vmatprep.subr.bf16.mxu0 %v4951_v32  ;;  %v4980_v49 = vld [vmem:[%s5355_s24 + $0x238] ss:$40 sps:$4 sm:$0xff]   ;;  %v4983_v36 = vld [vmem:[%s5355_s24 + $0x28c] ss:$40 sps:$4 sm:$0xff]   ;;  %v4986_v51 = vld [vmem:[%s5355_s24 + $0x288] ss:$40 sps:$4 sm:$0xff]  }
 0x2bf   : > { %2859 = vmatprep.subr.bf16.mxu1 %v4953_v33  ;;  %v4987_v52 = vld [vmem:[%s5355_s24 + $0x2d4] ss:$40 sps:$4 sm:$0xff]   ;;  %v4991_v54 = vld [vmem:[%s5355_s24 + $0x2d0] ss:$40 sps:$4 sm:$0xff]   ;;  %v4993_v56 = vld [vmem:[%s5355_s24 + $0x324] ss:$40 sps:$4 sm:$0xff]  }
 0x2c0   : > { %v4989_v53 = vld [vmem:[%s5355_s24 + $0x2dc] ss:$40 sps:$4 sm:$0xff]   ;;  %v4992_v55 = vld [vmem:[%s5355_s24 + $0x2d8] ss:$40 sps:$4 sm:$0xff]   ;;  %v4995_v57 = vld [vmem:[%s5355_s24 + $0x32c] ss:$40 sps:$4 sm:$0xff]  }
 0x2c1   : > { %2819 = vmatpush1.bf16.msra.mxu0 %v4955_v34  ;;  %s4584_s22 = sshll.u32 %s5347_s20, 2  ;;  %v4997_v58 = vld [vmem:[%s5355_s24 + $0x320] ss:$40 sps:$4 sm:$0xff]   ;;  %v4999_v60 = vld [vmem:[%s5355_s24 + $0x374] ss:$40 sps:$4 sm:$0xff]   ;;  %vm3077_vm10 = vcmask 1041408  }
 0x2c2   : > { %2860 = vmatpush1.bf16.msra.mxu1 %v4956_v20  ;;  %2820 = vmatprep.subr.bf16.mxu0 %v4957_v37  ;;  %v4998_v59 = vld [vmem:[%s5355_s24 + $0x328] ss:$40 sps:$4 sm:$0xff]   ;;  %v5001_v61 = vld [vmem:[%s5355_s24 + $0x37c] ss:$40 sps:$4 sm:$0xff]   ;;  %s1834_s23 = scalar_lea.vmem [#allocation2], %s4584_s22  ;;  %vm3078_vm11 = vcmask 388098  }
 0x2c3   : > { %2861 = vmatprep.subr.bf16.mxu1 %v4959_v39  ;;  %v4340_v63 = vld.sshfl [vmem:[%s1834_s23] sm:$0x33 pattern:$0x76325410]  ;;  %v5003_v0 = vld [vmem:[%s5355_s24 + $0x370] ss:$40 sps:$4 sm:$0xff]   ;;  %vm3079_vm12 = vmor %vm3078_vm11, %vm3077_vm10 }
 0x2c4   : > { %v5004_v1 = vld [vmem:[%s5355_s24 + $0x378] ss:$40 sps:$4 sm:$0xff]   ;;  %v1847_v2 = vcombine.high %v4340_v63, %v4340_v63  ;;  %v5005_v3 = vld [vmem:[%s5355_s24 + $0x3c4] ss:$40 sps:$4 sm:$0xff]   ;;  %v5010_v6 = vld [vmem:[%s5355_s24 + $0x3c8] ss:$40 sps:$4 sm:$0xff]   ;;  %v5934_v25 = vpack.c.bf16 %v4340_v63, %v4340_v63 }
 0x2c5   : > { %2821 = vmatpush1.bf16.msra.mxu0 %v4961_v24  ;;  %v5007_v62 = vld [vmem:[%s5355_s24 + $0x3cc] ss:$40 sps:$4 sm:$0xff]   ;;  %v5009_v5 = vld [vmem:[%s5355_s24 + $0x3c0] ss:$40 sps:$4 sm:$0xff]   ;;  %v5013_v8 = vld [vmem:[%s5355_s24 + $0x41c] ss:$40 sps:$4 sm:$0xff]  }
 0x2c6   : > { %2862 = vmatpush1.bf16.msra.mxu1 %v4962_v40  ;;  %2822 = vmatprep.subr.bf16.mxu0 %v4963_v41  ;;  %v5914_v4 = vpack.c.bf16 %v1847_v2, %v1847_v2  ;;  %v5011_v7 = vld [vmem:[%s5355_s24 + $0x414] ss:$40 sps:$4 sm:$0xff]   ;;  %v5015_v9 = vld [vmem:[%s5355_s24 + $0x410] ss:$40 sps:$4 sm:$0xff]   ;;  %v5017_v11 = vld [vmem:[%s5355_s24 + $0x464] ss:$40 sps:$4 sm:$0xff]  }
 0x2c7   : > { %2863 = vmatprep.subr.bf16.mxu1 %v4965_v42  ;;  %v5016_v10 = vld [vmem:[%s5355_s24 + $0x418] ss:$40 sps:$4 sm:$0xff]   ;;  %v5019_v12 = vld [vmem:[%s5355_s24 + $0x46c] ss:$40 sps:$4 sm:$0xff]   ;;  %v5022_v14 = vld [vmem:[%s5355_s24 + $0x468] ss:$40 sps:$4 sm:$0xff]  }
 0x2c8   : > { %2844 = vmatprep.mubr.bf16.mxu0 %v5914_v4  ;;  %2885 = vmatprep.mubr.bf16.mxu1 %v5914_v4  ;;  %v5021_v13 = vld [vmem:[%s5355_s24 + $0x460] ss:$40 sps:$4 sm:$0xff]   ;;  %v5023_v15 = vld [vmem:[%s5355_s24 + $0x4b4] ss:$40 sps:$4 sm:$0xff]   ;;  %v5027_v17 = vld [vmem:[%s5355_s24 + $0x4b0] ss:$40 sps:$4 sm:$0xff]  }
 0x2c9   : > { %2823 = vmatpush1.bf16.msra.mxu0 %v4967_v44  ;;  %v5025_v46 = vld [vmem:[%s5355_s24 + $0x4bc] ss:$40 sps:$4 sm:$0xff]   ;;  %v5028_v18 = vld [vmem:[%s5355_s24 + $0x4b8] ss:$40 sps:$4 sm:$0xff]   ;;  %v5040_v29 = vld [vmem:[%s5355_s24 + $0x6c] ss:$40 sps:$4 sm:$0xff]  }
 0x2ca   : > { %2864 = vmatpush1.bf16.msra.mxu1 %v4968_v45  ;;  %2824 = vmatprep.subr.bf16.mxu0 %v4969_v35  ;;  %v5031_v22 = vld [vmem:[%s5355_s24 + $0x14] ss:$40 sps:$4 sm:$0xff]   ;;  %v5029_v26 = vld [vmem:[%s5355_s24 + $0x10] ss:$40 sps:$4 sm:$0xff]   ;;  %v5037_v28 = vld [vmem:[%s5355_s24 + $0x64] ss:$40 sps:$4 sm:$0xff]  }
 0x2cb   : > { %2865 = vmatprep.subr.bf16.mxu1 %v4971_v19  ;;  %v5034_v16 = vld [vmem:[%s5355_s24 + $0x1c] ss:$40 sps:$4 sm:$0xff]   ;;  %v5032_v27 = vld [vmem:[%s5355_s24 + $0x18] ss:$40 sps:$4 sm:$0xff]   ;;  %v5038_v31 = vld [vmem:[%s5355_s24 + $0x68] ss:$40 sps:$4 sm:$0xff]  }
 0x2cc   : > { %v5035_v30 = vld [vmem:[%s5355_s24 + $0x60] ss:$40 sps:$4 sm:$0xff]   ;;  %v5043_v32 = vld [vmem:[%s5355_s24 + $0xb4] ss:$40 sps:$4 sm:$0xff]   ;;  %v5041_v34 = vld [vmem:[%s5355_s24 + $0xb0] ss:$40 sps:$4 sm:$0xff]  }
 0x2cd   : > { %2825 = vmatpush1.bf16.msra.mxu0 %v4973_v47  ;;  %v5046_v33 = vld [vmem:[%s5355_s24 + $0xbc] ss:$40 sps:$4 sm:$0xff]   ;;  %v5044_v20 = vld [vmem:[%s5355_s24 + $0xb8] ss:$40 sps:$4 sm:$0xff]   ;;  %v5052_v39 = vld [vmem:[%s5355_s24 + $0x10c] ss:$40 sps:$4 sm:$0xff]  }
 0x2ce   : > { %2866 = vmatpush1.bf16.msra.mxu1 %v4974_v43  ;;  %2826 = vmatprep.subr.bf16.mxu0 %v4975_v38  ;;  %v5049_v37 = vld [vmem:[%s5355_s24 + $0x104] ss:$40 sps:$4 sm:$0xff]   ;;  %v5047_v24 = vld [vmem:[%s5355_s24 + $0x100] ss:$40 sps:$4 sm:$0xff]   ;;  %v5055_v41 = vld [vmem:[%s5355_s24 + $0x154] ss:$40 sps:$4 sm:$0xff]  }
 0x2cf   : > { %2867 = vmatprep.subr.bf16.mxu1 %v4977_v48  ;;  %v5050_v40 = vld [vmem:[%s5355_s24 + $0x108] ss:$40 sps:$4 sm:$0xff]   ;;  %v5058_v42 = vld [vmem:[%s5355_s24 + $0x15c] ss:$40 sps:$4 sm:$0xff]   ;;  %v5056_v45 = vld [vmem:[%s5355_s24 + $0x158] ss:$40 sps:$4 sm:$0xff]  }
 0x2d0   : > { %v5053_v44 = vld [vmem:[%s5355_s24 + $0x150] ss:$40 sps:$4 sm:$0xff]   ;;  %v5061_v35 = vld [vmem:[%s5355_s24 + $0x1a4] ss:$40 sps:$4 sm:$0xff]   ;;  %v5059_v47 = vld [vmem:[%s5355_s24 + $0x1a0] ss:$40 sps:$4 sm:$0xff]  }
 0x2d1   : > { %2827 = vmatpush1.bf16.msra.mxu0 %v4979_v23  ;;  %v5064_v19 = vld [vmem:[%s5355_s24 + $0x1ac] ss:$40 sps:$4 sm:$0xff]   ;;  %v5062_v43 = vld [vmem:[%s5355_s24 + $0x1a8] ss:$40 sps:$4 sm:$0xff]   ;;  %v5070_v48 = vld [vmem:[%s5355_s24 + $0x1fc] ss:$40 sps:$4 sm:$0xff]  }
 0x2d2   : > { %2868 = vmatpush1.bf16.msra.mxu1 %v4980_v49  ;;  %2828 = vmatprep.subr.bf16.mxu0 %v4981_v21  ;;  %v5067_v38 = vld [vmem:[%s5355_s24 + $0x1f4] ss:$40 sps:$4 sm:$0xff]   ;;  %v5065_v23 = vld [vmem:[%s5355_s24 + $0x1f0] ss:$40 sps:$4 sm:$0xff]   ;;  %v5073_v21 = vld [vmem:[%s5355_s24 + $0x244] ss:$40 sps:$4 sm:$0xff]  }
 0x2d3   : > { %2869 = vmatprep.subr.bf16.mxu1 %v4983_v36  ;;  %v5068_v49 = vld [vmem:[%s5355_s24 + $0x1f8] ss:$40 sps:$4 sm:$0xff]   ;;  %v5076_v36 = vld [vmem:[%s5355_s24 + $0x24c] ss:$40 sps:$4 sm:$0xff]   ;;  %p4501_p5 = scmp.ne.s32.totalorder %s5347_s20, 4 }
 0x2d4   : > { %v5089_v63 = vld [vmem:[%s5355_s24 + $0x330] ss:$40 sps:$4 sm:$0xff]   ;;  %v5100_v2 = vld [vmem:[%s5355_s24 + $0x38c] ss:$40 sps:$4 sm:$0xff]   ;;  %vm3885_vm13 = vcmask (!%p4501_p5), 392192   ;;  %vm4113_vm14 = vcmask (!%p4501_p5), 1043456  }
 0x2d5   : > { %2829 = vmatpush1.bf16.msra.mxu0 %v4985_v50  ;;  %v5071_v50 = vld [vmem:[%s5355_s24 + $0x240] ss:$40 sps:$4 sm:$0xff]   ;;  %vm5277_vm15 = vmmov (!%p4501_p5), 0   ;;  %vm4109_vm0 = vcmask (!%p4501_p5), 818176   ;;  %vm4187_vm1 = vcmask (!%p4501_p5), 1024  }
 0x2d6   : > { %2870 = vmatpush1.bf16.msra.mxu1 %v4986_v51  ;;  %2830 = vmatprep.subr.bf16.mxu0 %v4987_v52  ;;  %v5074_v51 = vld [vmem:[%s5355_s24 + $0x248] ss:$40 sps:$4 sm:$0xff]   ;;  %v5079_v52 = vld [vmem:[%s5355_s24 + $0x294] ss:$40 sps:$4 sm:$0xff]  }
 0x2d7   : > { %2871 = vmatprep.subr.bf16.mxu1 %v4989_v53  ;;  %v5082_v53 = vld [vmem:[%s5355_s24 + $0x29c] ss:$40 sps:$4 sm:$0xff]  }
 0x2d9   : > { %2831 = vmatpush1.bf16.msra.mxu0 %v4991_v54  ;;  %v5077_v54 = vld [vmem:[%s5355_s24 + $0x290] ss:$40 sps:$4 sm:$0xff]  }
 0x2da   : > { %2872 = vmatpush1.bf16.msra.mxu1 %v4992_v55  ;;  %2832 = vmatprep.subr.bf16.mxu0 %v4993_v56  ;;  %v5080_v55 = vld [vmem:[%s5355_s24 + $0x298] ss:$40 sps:$4 sm:$0xff]   ;;  %v5085_v56 = vld [vmem:[%s5355_s24 + $0x2e4] ss:$40 sps:$4 sm:$0xff]  }
 0x2db   : > { %2873 = vmatprep.subr.bf16.mxu1 %v4995_v57  ;;  %v5088_v57 = vld [vmem:[%s5355_s24 + $0x2ec] ss:$40 sps:$4 sm:$0xff]  }
 0x2dd   : > { %2833 = vmatpush1.bf16.msra.mxu0 %v4997_v58  ;;  %v5083_v58 = vld [vmem:[%s5355_s24 + $0x2e0] ss:$40 sps:$4 sm:$0xff]  }
 0x2de   : > { %2874 = vmatpush1.bf16.msra.mxu1 %v4998_v59  ;;  %2834 = vmatprep.subr.bf16.mxu0 %v4999_v60  ;;  %v5086_v59 = vld [vmem:[%s5355_s24 + $0x2e8] ss:$40 sps:$4 sm:$0xff]   ;;  %v5091_v60 = vld [vmem:[%s5355_s24 + $0x334] ss:$40 sps:$4 sm:$0xff]  }
 0x2df   : > { %2875 = vmatprep.subr.bf16.mxu1 %v5001_v61  ;;  %v5094_v61 = vld [vmem:[%s5355_s24 + $0x33c] ss:$40 sps:$4 sm:$0xff]  }
 0x2e1   : > { %2835 = vmatpush1.bf16.msra.mxu0 %v5003_v0  ;;  %v5092_v0 = vld [vmem:[%s5355_s24 + $0x338] ss:$40 sps:$4 sm:$0xff]  }
 0x2e2   : > { %2876 = vmatpush1.bf16.msra.mxu1 %v5004_v1  ;;  %2836 = vmatprep.subr.bf16.mxu0 %v5005_v3  ;;  %v5097_v1 = vld [vmem:[%s5355_s24 + $0x384] ss:$40 sps:$4 sm:$0xff]   ;;  %v5095_v3 = vld [vmem:[%s5355_s24 + $0x380] ss:$40 sps:$4 sm:$0xff]  }
 0x2e3   : > { %2877 = vmatprep.subr.bf16.mxu1 %v5007_v62  ;;  %v5098_v62 = vld [vmem:[%s5355_s24 + $0x388] ss:$40 sps:$4 sm:$0xff]  }
 0x2e5   : > { %2837 = vmatpush1.bf16.msra.mxu0 %v5009_v5  ;;  %v5103_v5 = vld [vmem:[%s5355_s24 + $0x3d4] ss:$40 sps:$4 sm:$0xff]  }
 0x2e6   : > { %2878 = vmatpush1.bf16.msra.mxu1 %v5010_v6  ;;  %2838 = vmatprep.subr.bf16.mxu0 %v5011_v7  ;;  %v5106_v6 = vld [vmem:[%s5355_s24 + $0x3dc] ss:$40 sps:$4 sm:$0xff]   ;;  %v5101_v7 = vld [vmem:[%s5355_s24 + $0x3d0] ss:$40 sps:$4 sm:$0xff]  }
 0x2e7   : > { %2879 = vmatprep.subr.bf16.mxu1 %v5013_v8  ;;  %v5104_v8 = vld [vmem:[%s5355_s24 + $0x3d8] ss:$40 sps:$4 sm:$0xff]  }
 0x2e9   : > { %2839 = vmatpush1.bf16.msra.mxu0 %v5015_v9  ;;  %v5109_v9 = vld [vmem:[%s5355_s24 + $0x424] ss:$40 sps:$4 sm:$0xff]  }
 0x2ea   : > { %2880 = vmatpush1.bf16.msra.mxu1 %v5016_v10  ;;  %2840 = vmatprep.subr.bf16.mxu0 %v5017_v11  ;;  %v5112_v10 = vld [vmem:[%s5355_s24 + $0x42c] ss:$40 sps:$4 sm:$0xff]   ;;  %v5107_v11 = vld [vmem:[%s5355_s24 + $0x420] ss:$40 sps:$4 sm:$0xff]  }
 0x2eb   : > { %2881 = vmatprep.subr.bf16.mxu1 %v5019_v12  ;;  %v5110_v12 = vld [vmem:[%s5355_s24 + $0x428] ss:$40 sps:$4 sm:$0xff]  }
 0x2ed   : > { %2841 = vmatpush1.bf16.msra.mxu0 %v5021_v13  ;;  %v5115_v13 = vld [vmem:[%s5355_s24 + $0x474] ss:$40 sps:$4 sm:$0xff]  }
 0x2ee   : > { %2882 = vmatpush1.bf16.msra.mxu1 %v5022_v14  ;;  %2842 = vmatprep.subr.bf16.mxu0 %v5023_v15  ;;  %v5118_v14 = vld [vmem:[%s5355_s24 + $0x47c] ss:$40 sps:$4 sm:$0xff]   ;;  %v5113_v15 = vld [vmem:[%s5355_s24 + $0x470] ss:$40 sps:$4 sm:$0xff]  }
 0x2ef   : > { %2883 = vmatprep.subr.bf16.mxu1 %v5025_v46  ;;  %v5116_v46 = vld [vmem:[%s5355_s24 + $0x478] ss:$40 sps:$4 sm:$0xff]  }
 0x2f1   : > { %2843 = vmatpush1.bf16.msra.mxu0 %v5027_v17  ;;  %v5121_v17 = vld [vmem:[%s5355_s24 + $0x4c4] ss:$40 sps:$4 sm:$0xff]  }
 0x2f2   : > { %2884 = vmatpush1.bf16.msra.mxu1 %v5028_v18  ;;  %2894 = vmatprep.subr.bf16.mxu0 %v5031_v22  ;;  %v5124_v18 = vld [vmem:[%s5355_s24 + $0x4cc] ss:$40 sps:$4 sm:$0xff]   ;;  %v5119_v22 = vld [vmem:[%s5355_s24 + $0x4c0] ss:$40 sps:$4 sm:$0xff]  }
 0x2f3   : > { %2935 = vmatprep.subr.bf16.mxu1 %v5034_v16  ;;  %v5122_v16 = vld [vmem:[%s5355_s24 + $0x4c8] ss:$40 sps:$4 sm:$0xff]  }
 0x2f4   : > { %2845 = vmatmul.mubr.bf16.vlgmr.msra.gmra.mrb[0].mxu0 %v5934_v25 }
 0x2f5   : > { %2886 = vmatmul.mubr.bf16.vlgmr.msra.gmra.mrb[0].mxu1 %v5934_v25  ;;  %2895 = vmatpush1.bf16.msra.mxu0 %v5029_v26  ;;  %v5127_v26 = vld [vmem:[%s5355_s24 + $0x24] ss:$40 sps:$4 sm:$0xff]  }
 0x2f6   : > { %2936 = vmatpush1.bf16.msra.mxu1 %v5032_v27  ;;  %2896 = vmatprep.subr.bf16.mxu0 %v5037_v28  ;;  %v5125_v27 = vld [vmem:[%s5355_s24 + $0x20] ss:$40 sps:$4 sm:$0xff]   ;;  %v5130_v28 = vld [vmem:[%s5355_s24 + $0x74] ss:$40 sps:$4 sm:$0xff]  }
 0x2f7   : > { %2937 = vmatprep.subr.bf16.mxu1 %v5040_v29  ;;  %2926 = vmatprep.mubr.bf16.mxu0 %v5914_v4  ;;  %v5128_v29 = vld [vmem:[%s5355_s24 + $0x70] ss:$40 sps:$4 sm:$0xff]  }
 0x2f8   : > { %2967 = vmatprep.mubr.bf16.mxu1 %v5914_v4 }
 0x2f9   : > { %2897 = vmatpush1.bf16.msra.mxu0 %v5035_v30  ;;  %v5133_v30 = vld [vmem:[%s5355_s24 + $0xc4] ss:$40 sps:$4 sm:$0xff]  }
 0x2fa   : > { %2938 = vmatpush1.bf16.msra.mxu1 %v5038_v31  ;;  %2898 = vmatprep.subr.bf16.mxu0 %v5043_v32  ;;  %v5131_v31 = vld [vmem:[%s5355_s24 + $0xc0] ss:$40 sps:$4 sm:$0xff]   ;;  %v5136_v32 = vld [vmem:[%s5355_s24 + $0x114] ss:$40 sps:$4 sm:$0xff]  }
 0x2fb   : > { %2939 = vmatprep.subr.bf16.mxu1 %v5046_v33  ;;  %v5134_v33 = vld [vmem:[%s5355_s24 + $0x110] ss:$40 sps:$4 sm:$0xff]  }
 0x2fd   : > { %2899 = vmatpush1.bf16.msra.mxu0 %v5041_v34  ;;  %v5139_v34 = vld [vmem:[%s5355_s24 + $0x164] ss:$40 sps:$4 sm:$0xff]  }
 0x2fe   : > { %2940 = vmatpush1.bf16.msra.mxu1 %v5044_v20  ;;  %2900 = vmatprep.subr.bf16.mxu0 %v5049_v37  ;;  %v5137_v20 = vld [vmem:[%s5355_s24 + $0x160] ss:$40 sps:$4 sm:$0xff]   ;;  %v5140_v37 = vld [vmem:[%s5355_s24 + $0x1b0] ss:$40 sps:$4 sm:$0xff]  }
 0x2ff   : > { %2941 = vmatprep.subr.bf16.mxu1 %v5052_v39  ;;  %v5145_v39 = vld [vmem:[%s5355_s24 + $0x204] ss:$40 sps:$4 sm:$0xff]  }
 0x301   : > { %2901 = vmatpush1.bf16.msra.mxu0 %v5047_v24  ;;  %v5143_v24 = vld [vmem:[%s5355_s24 + $0x200] ss:$40 sps:$4 sm:$0xff]  }
 0x302   : > { %2942 = vmatpush1.bf16.msra.mxu1 %v5050_v40  ;;  %2902 = vmatprep.subr.bf16.mxu0 %v5055_v41  ;;  %v5148_v40 = vld [vmem:[%s5355_s24 + $0x254] ss:$40 sps:$4 sm:$0xff]   ;;  %v5146_v41 = vld [vmem:[%s5355_s24 + $0x250] ss:$40 sps:$4 sm:$0xff]  }
 0x303   : > { %2943 = vmatprep.subr.bf16.mxu1 %v5058_v42  ;;  %v5151_v42 = vld [vmem:[%s5355_s24 + $0x2a4] ss:$40 sps:$4 sm:$0xff]  }
 0x305   : > { %2903 = vmatpush1.bf16.msra.mxu0 %v5053_v44  ;;  %v5149_v44 = vld [vmem:[%s5355_s24 + $0x2a0] ss:$40 sps:$4 sm:$0xff]  }
 0x306   : > { %2944 = vmatpush1.bf16.msra.mxu1 %v5056_v45  ;;  %2904 = vmatprep.subr.bf16.mxu0 %v5061_v35  ;;  %v5154_v45 = vld [vmem:[%s5355_s24 + $0x2f4] ss:$40 sps:$4 sm:$0xff]   ;;  %v5152_v35 = vld [vmem:[%s5355_s24 + $0x2f0] ss:$40 sps:$4 sm:$0xff]  }
 0x307   : > { %2945 = vmatprep.subr.bf16.mxu1 %v5064_v19  ;;  %v5157_v19 = vld [vmem:[%s5355_s24 + $0x344] ss:$40 sps:$4 sm:$0xff]  }
 0x309   : > { %2905 = vmatpush1.bf16.msra.mxu0 %v5059_v47  ;;  %v5155_v47 = vld [vmem:[%s5355_s24 + $0x340] ss:$40 sps:$4 sm:$0xff]  }
 0x30a   : > { %2946 = vmatpush1.bf16.msra.mxu1 %v5062_v43  ;;  %2906 = vmatprep.subr.bf16.mxu0 %v5067_v38  ;;  %v5160_v43 = vld [vmem:[%s5355_s24 + $0x394] ss:$40 sps:$4 sm:$0xff]   ;;  %v5158_v38 = vld [vmem:[%s5355_s24 + $0x390] ss:$40 sps:$4 sm:$0xff]  }
 0x30b   : > { %2947 = vmatprep.subr.bf16.mxu1 %v5070_v48  ;;  %v5163_v48 = vld [vmem:[%s5355_s24 + $0x3e4] ss:$40 sps:$4 sm:$0xff]  }
 0x30d   : > { %2907 = vmatpush1.bf16.msra.mxu0 %v5065_v23  ;;  %v5161_v23 = vld [vmem:[%s5355_s24 + $0x3e0] ss:$40 sps:$4 sm:$0xff]  }
 0x30e   : > { %2948 = vmatpush1.bf16.msra.mxu1 %v5068_v49  ;;  %2908 = vmatprep.subr.bf16.mxu0 %v5073_v21  ;;  %v5166_v49 = vld [vmem:[%s5355_s24 + $0x434] ss:$40 sps:$4 sm:$0xff]   ;;  %v5164_v21 = vld [vmem:[%s5355_s24 + $0x430] ss:$40 sps:$4 sm:$0xff]  }
 0x30f   : > { %2949 = vmatprep.subr.bf16.mxu1 %v5076_v36  ;;  %v5169_v36 = vld [vmem:[%s5355_s24 + $0x484] ss:$40 sps:$4 sm:$0xff]  }
 0x311   : > { %2909 = vmatpush1.bf16.msra.mxu0 %v5071_v50  ;;  %v5167_v50 = vld [vmem:[%s5355_s24 + $0x480] ss:$40 sps:$4 sm:$0xff]  }
 0x312   : > { %2950 = vmatpush1.bf16.msra.mxu1 %v5074_v51  ;;  %2910 = vmatprep.subr.bf16.mxu0 %v5079_v52  ;;  %v5172_v51 = vld [vmem:[%s5355_s24 + $0x4d4] ss:$40 sps:$4 sm:$0xff]   ;;  %v5170_v52 = vld [vmem:[%s5355_s24 + $0x4d0] ss:$40 sps:$4 sm:$0xff]  }
 0x313   : > { %2951 = vmatprep.subr.bf16.mxu1 %v5082_v53  ;;  %v5273_v53 = vmov 1983009808  }
 0x315   : > { %2911 = vmatpush1.bf16.msra.mxu0 %v5077_v54  ;;  %v3030_v54 = vunpack.c.l.s4 %v5273_v53  ;;  %v5193_v53 = vld [vmem:[%s6369_s7 + $0x68] sm:$0xff] (!%p4501_p5)  }
 0x316   : > { %2952 = vmatpush1.bf16.msra.mxu1 %v5080_v55  ;;  %2912 = vmatprep.subr.bf16.mxu0 %v5085_v56  ;;  %v3032_v55 = vlaneseq }
 0x317   : > { %2953 = vmatprep.subr.bf16.mxu1 %v5088_v57  ;;  %v3031_v56 = vunpack.c.0.s8 %v3030_v54  ;;  %v5194_v54 = vld [vmem:[%s6369_s7 + $0x28] sm:$0xff] (!%p4501_p5)  }
 0x318   : > { %v6038_v57 = vshrl.u32 %v3032_v55, 7  ;;  %v5195_v55 = vld [vmem:[%s6369_s7 + $0xe8] sm:$0xff] (!%p4501_p5)  }
 0x319   : > { %2913 = vmatpush1.bf16.msra.mxu0 %v5083_v58 }
 0x31a   : > { %2954 = vmatpush1.bf16.msra.mxu1 %v5086_v59  ;;  %2914 = vmatprep.subr.bf16.mxu0 %v5091_v60  ;;  %v6041_v60 = vsub.s32 %v3031_v56, %v6038_v57  ;;  %v5196_v56 = vld [vmem:[%s6369_s7 + $0xa8] sm:$0xff] (!%p4501_p5)  }
 0x31b   : > { %2955 = vmatprep.subr.bf16.mxu1 %v5094_v61 }
 0x31d   : > { %2915 = vmatpush1.bf16.msra.mxu0 %v5089_v63 }
 0x31e   : > { %2956 = vmatpush1.bf16.msra.mxu1 %v5092_v0  ;;  %2916 = vmatprep.subr.bf16.mxu0 %v5097_v1 }
 0x31f   : > { %2957 = vmatprep.subr.bf16.mxu1 %v5100_v2 }
 0x321   : > { %2917 = vmatpush1.bf16.msra.mxu0 %v5095_v3 }
 0x322   : > { %2958 = vmatpush1.bf16.msra.mxu1 %v5098_v62  ;;  %2918 = vmatprep.subr.bf16.mxu0 %v5103_v5 }
 0x323   : > { %2959 = vmatprep.subr.bf16.mxu1 %v5106_v6 }
 0x325   : > { %2919 = vmatpush1.bf16.msra.mxu0 %v5101_v7  ;;  %v1836_v7 = vld [vmem:[#allocation4] sm:$0xff] }
 0x326   : > { %2960 = vmatpush1.bf16.msra.mxu1 %v5104_v8  ;;  %2920 = vmatprep.subr.bf16.mxu0 %v5109_v9 }
 0x327   : > { %2961 = vmatprep.subr.bf16.mxu1 %v5112_v10 }
 0x329   : > { %2921 = vmatpush1.bf16.msra.mxu0 %v5107_v11 }
 0x32a   : > { %2962 = vmatpush1.bf16.msra.mxu1 %v5110_v12  ;;  %2922 = vmatprep.subr.bf16.mxu0 %v5115_v13 }
 0x32b   : > { %2963 = vmatprep.subr.bf16.mxu1 %v5118_v14 }
 0x32d   : > { %2923 = vmatpush1.bf16.msra.mxu0 %v5113_v15 }
 0x32e   : > { %2964 = vmatpush1.bf16.msra.mxu1 %v5116_v46  ;;  %2924 = vmatprep.subr.bf16.mxu0 %v5121_v17 }
 0x32f   : > { %2965 = vmatprep.subr.bf16.mxu1 %v5124_v18 }
 0x331   : > { %2925 = vmatpush1.bf16.msra.mxu0 %v5119_v22 }
 0x332   : > { %2966 = vmatpush1.bf16.msra.mxu1 %v5122_v16  ;;  %2976 = vmatprep.subr.bf16.mxu0 %v5127_v26 }
 0x334   : > { %2927 = vmatmul.mubr.bf16.vlgmr.msra.gmra.mrb[4].mxu0 %v5934_v25 }
 0x335   : > { %2968 = vmatmul.mubr.bf16.vlgmr.msra.gmra.mrb[4].mxu1 %v5934_v25  ;;  %2977 = vmatpush1.bf16.msra.mxu0 %v5125_v27  ;;  %v1837_v27 = vld [vmem:[#allocation4 + $0x8] sm:$0xff] }
 0x336   : > { %3008 = vmatprep.mubr.bf16.mxu0 %v5914_v4  ;;  %2978 = vmatprep.subr.bf16.mxu0 %v5130_v28  ;;  %v5142_v4 = vld [vmem:[%s5355_s24 + $0x1b4] ss:$40 sps:$4 sm:$0xff]  }
 0x339   : > { %2979 = vmatpush1.bf16.msra.mxu0 %v5128_v29 }
 0x33a   : > { %2980 = vmatprep.subr.bf16.mxu0 %v5133_v30 }
 0x33d   : > { %2981 = vmatpush1.bf16.msra.mxu0 %v5131_v31 }
 0x33e   : > { %2982 = vmatprep.subr.bf16.mxu0 %v5136_v32 }
 0x341   : > { %2983 = vmatpush1.bf16.msra.mxu0 %v5134_v33 }
 0x342   : > { %2984 = vmatprep.subr.bf16.mxu0 %v5139_v34  ;;  %v1838_v34 = vld [vmem:[#allocation4 + $0x10] sm:$0xf] }
 0x345   : > { %2985 = vmatpush1.bf16.msra.mxu0 %v5137_v20 }
 0x346   : > { %2986 = vmatprep.subr.bf16.mxu0 %v5142_v4 }
 0x349   : > { %2987 = vmatpush1.bf16.msra.mxu0 %v5140_v37 }
 0x34a   : > { %2988 = vmatprep.subr.bf16.mxu0 %v5145_v39  ;;  %v5173_v39 = vld [vmem:[%s6369_s7 + $0x40] sm:$0xff] (!%p4501_p5)  }
 0x34d   : > { %2989 = vmatpush1.bf16.msra.mxu0 %v5143_v24  ;;  %v5174_v24 = vld [vmem:[%s6369_s7] sm:$0xff] (!%p4501_p5)  }
 0x34e   : > { %2990 = vmatprep.subr.bf16.mxu0 %v5148_v40  ;;  %v5175_v40 = vld [vmem:[%s6369_s7 + $0xc0] sm:$0xff] (!%p4501_p5)  }
 0x34f   : > { %4611 = vmatprep.subr.bf16.mxu1 (!%p4501_p5), %v5175_v40 }
 0x351   : > { %2991 = vmatpush1.bf16.msra.mxu0 %v5146_v41  ;;  %v5176_v41 = vld [vmem:[%s6369_s7 + $0x80] sm:$0xff] (!%p4501_p5)  }
 0x352   : > { %2992 = vmatprep.subr.bf16.mxu0 %v5151_v42  ;;  %v5177_v42 = vld [vmem:[%s6369_s7 + $0x48] sm:$0xff] (!%p4501_p5)   ;;  %4612 = vmatpush3.bf16.msra.mxu1 (!%p4501_p5), %v5176_v41 }
 0x355   : > { %2993 = vmatpush1.bf16.msra.mxu0 %v5149_v44  ;;  %v5178_v44 = vld [vmem:[%s6369_s7 + $0x8] sm:$0xff] (!%p4501_p5)  }
 0x356   : > { %2994 = vmatprep.subr.bf16.mxu0 %v5154_v45  ;;  %v5179_v45 = vld [vmem:[%s6369_s7 + $0xc8] sm:$0xff] (!%p4501_p5)  }
 0x357   : > { %4613 = vmatprep.subr.bf16.mxu1 (!%p4501_p5), %v5179_v45 }
 0x359   : > { %2995 = vmatpush1.bf16.msra.mxu0 %v5152_v35  ;;  %v5180_v35 = vld [vmem:[%s6369_s7 + $0x88] sm:$0xff] (!%p4501_p5)  }
 0x35a   : > { %2996 = vmatprep.subr.bf16.mxu0 %v5157_v19  ;;  %v5181_v19 = vld [vmem:[%s6369_s7 + $0x50] sm:$0xff] (!%p4501_p5)   ;;  %4614 = vmatpush3.bf16.msra.mxu1 (!%p4501_p5), %v5180_v35 }
 0x35d   : > { %2997 = vmatpush1.bf16.msra.mxu0 %v5155_v47  ;;  %v5182_v47 = vld [vmem:[%s6369_s7 + $0x10] sm:$0xff] (!%p4501_p5)  }
 0x35e   : > { %2998 = vmatprep.subr.bf16.mxu0 %v5160_v43  ;;  %v5183_v43 = vld [vmem:[%s6369_s7 + $0xd0] sm:$0xff] (!%p4501_p5)  }
 0x35f   : > { %4615 = vmatprep.subr.bf16.mxu1 (!%p4501_p5), %v5183_v43 }
 0x361   : > { %2999 = vmatpush1.bf16.msra.mxu0 %v5158_v38  ;;  %v5184_v38 = vld [vmem:[%s6369_s7 + $0x90] sm:$0xff] (!%p4501_p5)  }
 0x362   : > { %3000 = vmatprep.subr.bf16.mxu0 %v5163_v48  ;;  %v5185_v48 = vld [vmem:[%s6369_s7 + $0x58] sm:$0xff] (!%p4501_p5)   ;;  %4616 = vmatpush3.bf16.msra.mxu1 (!%p4501_p5), %v5184_v38 }
 0x365   : > { %3001 = vmatpush1.bf16.msra.mxu0 %v5161_v23  ;;  %v5186_v23 = vld [vmem:[%s6369_s7 + $0x18] sm:$0xff] (!%p4501_p5)  }
 0x366   : > { %3002 = vmatprep.subr.bf16.mxu0 %v5166_v49  ;;  %v5187_v49 = vld [vmem:[%s6369_s7 + $0xd8] sm:$0xff] (!%p4501_p5)  }
 0x367   : > { %4617 = vmatprep.subr.bf16.mxu1 (!%p4501_p5), %v5187_v49 }
 0x369   : > { %3003 = vmatpush1.bf16.msra.mxu0 %v5164_v21  ;;  %v5188_v21 = vld [vmem:[%s6369_s7 + $0x98] sm:$0xff] (!%p4501_p5)  }
 0x36a   : > { %3004 = vmatprep.subr.bf16.mxu0 %v5169_v36  ;;  %v5189_v36 = vld [vmem:[%s6369_s7 + $0x60] sm:$0xff] (!%p4501_p5)   ;;  %4618 = vmatpush3.bf16.msra.mxu1 (!%p4501_p5), %v5188_v21 }
 0x36d   : > { %3005 = vmatpush1.bf16.msra.mxu0 %v5167_v50  ;;  %v5190_v50 = vld [vmem:[%s6369_s7 + $0x20] sm:$0xff] (!%p4501_p5)  }
 0x36e   : > { %3006 = vmatprep.subr.bf16.mxu0 %v5172_v51  ;;  %v5191_v51 = vld [vmem:[%s6369_s7 + $0xe0] sm:$0xff] (!%p4501_p5)  }
 0x36f   : > { %4619 = vmatprep.subr.bf16.mxu1 (!%p4501_p5), %v5191_v51  ;;  %v3089_v51 = vld [vmem:[%s6368_s6 + $0x8] sm:$0x3] (!%p4501_p5) }
 0x371   : > { %3007 = vmatpush1.bf16.msra.mxu0 %v5170_v52  ;;  %v5192_v52 = vld [vmem:[%s6369_s7 + $0xa0] sm:$0xff] (!%p4501_p5)  }
 0x372   : > { %4589 = vmatprep.subr.bf16.mxu0 (!%p4501_p5), %v5173_v39  ;;  %4620 = vmatpush3.bf16.msra.mxu1 (!%p4501_p5), %v5192_v52 }
 0x373   : > { %4621 = vmatprep.subr.bf16.mxu1 (!%p4501_p5), %v5195_v55 }
 0x374   : > { %3009 = vmatmul.mubr.bf16.vlgmr.msra.gmra.mrb[8].mxu0 %v5934_v25 }
 0x375   : > { %4590 = vmatpush3.bf16.msra.mxu0 (!%p4501_p5), %v5174_v24 }
 0x376   : > { %4591 = vmatprep.subr.bf16.mxu0 (!%p4501_p5), %v5177_v42  ;;  %4622 = vmatpush3.bf16.msra.mxu1 (!%p4501_p5), %v5196_v56 }
 0x379   : > { %4592 = vmatpush3.bf16.msra.mxu0 (!%p4501_p5), %v5178_v44 }
 0x37a   : > { %4593 = vmatprep.subr.bf16.mxu0 (!%p4501_p5), %v5181_v19 }
 0x37d   : > { %4594 = vmatpush3.bf16.msra.mxu0 (!%p4501_p5), %v5182_v47  ;;  %v3195_v47 = vld [vmem:[#allocation3] sm:$0xff] (!%p4501_p5) }
 0x37e   : > { %4595 = vmatprep.subr.bf16.mxu0 (!%p4501_p5), %v5185_v48 }
 0x381   : > { %4596 = vmatpush3.bf16.msra.mxu0 (!%p4501_p5), %v5186_v23 }
 0x382   : > { %4597 = vmatprep.subr.bf16.mxu0 (!%p4501_p5), %v5189_v36 }
 0x385   : > { %4598 = vmatpush3.bf16.msra.mxu0 (!%p4501_p5), %v5190_v50 }
 0x386   : > { %4599 = vmatprep.subr.bf16.mxu0 (!%p4501_p5), %v5193_v53 }
 0x389   : > { %4600 = vmatpush3.bf16.msra.mxu0 (!%p4501_p5), %v5194_v54 }
 0x3c7   : > { %v2846_v58 = vpop.f32.mrb[0].mxu0 }
 0x3c8   : > { %v2887_v59 = vpop.f32.mrb[0].mxu1  ;;  %v2848_v61 = vpop.f32.mrb[1].mxu0 }
 0x3c9   : > { %v2889_v63 = vpop.f32.mrb[1].mxu1  ;;  %v3027_v0 = vcombine.low %v2846_v58, %v2848_v61  ;;  %v2850_v2 = vpop.f32.mrb[2].mxu0  ;;  %v5197_v58 = vld [vmem:[%s6369_s7 + $0x70] sm:$0xff] (!%p4501_p5)  }
 0x3ca   : > { %v3028_v1 = vcombine.low %v2887_v59, %v2889_v63  ;;  %v2891_v3 = vpop.f32.mrb[2].mxu1  ;;  %v2851_v62 = vpop.f32.mrb[3].mxu0  ;;  %v5198_v59 = vld [vmem:[%s6369_s7 + $0x30] sm:$0xff] (!%p4501_p5)   ;;  %4601 = vmatprep.subr.bf16.mxu0 (!%p4501_p5), %v5197_v58  ;;  %v3094_v63 = vsub.s32 (!%p4501_p5), 0, %v6038_v57  ;;  %v5201_v2 = vld [vmem:[%s6369_s7 + $0x78] sm:$0xff] (!%p4501_p5)  }
 0x3cb   : > { %v2892_v5 = vpop.f32.mrb[3].mxu1  ;;  %v3035_v25 = vrot.slane %v3027_v0, %v6041_v60  ;;  %v5199_v61 = vld [vmem:[%s6369_s7 + $0xf0] sm:$0xff] (!%p4501_p5)   ;;  %4602 = vmatpush3.bf16.msra.mxu0 (!%p4501_p5), %v5198_v59  ;;  %v3102_v3 = vsub.s32 (!%p4501_p5), 2, %v6038_v57  ;;  %v5202_v62 = vld [vmem:[%s6369_s7 + $0x38] sm:$0xff] (!%p4501_p5)  }
 0x3cc   : > { %v3042_v6 = vrot.slane %v3028_v1, %v6041_v60  ;;  %v5200_v0 = vld [vmem:[%s6369_s7 + $0xb0] sm:$0xff] (!%p4501_p5)   ;;  %v3098_v1 = vsub.s32 (!%p4501_p5), 1, %v6038_v57  ;;  %4623 = vmatprep.subr.bf16.mxu1 (!%p4501_p5), %v5199_v61  ;;  %v3106_v5 = vsub.s32 (!%p4501_p5), 3, %v6038_v57  ;;  %4603 = vmatprep.subr.bf16.mxu0 (!%p4501_p5), %v5201_v2  ;;  %v3127_v52 = vrot.slane (!%p4501_p5), %v3089_v51, %v3094_v63 }
 0x3cd   : > { %4624 = vmatpush3.bf16.msra.mxu1 (!%p4501_p5), %v5200_v0  ;;  %v5206_v0 = vld [vmem:[%s6369_s7 + $0x100] sm:$0xff] (!%p4501_p5)  }
 0x3ce   : > { %v3043_v8 = vcombine.low %v3035_v25, %v3042_v6  ;;  %v5203_v25 = vld [vmem:[%s6369_s7 + $0xf8] sm:$0xff] (!%p4501_p5)   ;;  %v3131_v53 = vrot.slane (!%p4501_p5), %v3089_v51, %v3098_v1 }
 0x3cf   : > { %4604 = vmatpush3.bf16.msra.mxu0 (!%p4501_p5), %v5202_v62  ;;  %v5204_v6 = vld [vmem:[%s6369_s7 + $0xb8] sm:$0xff] (!%p4501_p5)   ;;  %4625 = vmatprep.subr.bf16.mxu1 (!%p4501_p5), %v5203_v25  ;;  %v5208_v25 = vld [vmem:[%s6369_s7 + $0x180] sm:$0xff] (!%p4501_p5)  }
 0x3d0   : > { %v3072_v9 = vadd.f32 %v3043_v8, %v1836_v7  ;;  %v3088_v7 = vld [vmem:[%s6368_s6] sm:$0xff] (!%p4501_p5)  ;;  %v3166_v58 = vcombine.low (!%p4501_p5), %v3127_v52, %v3131_v53  ;;  %v5236_v52 = vld [vmem:[%s6369_s7 + $0x1b8] sm:$0xff] (!%p4501_p5)  }
 0x3d1   : > { %4626 = vmatpush3.bf16.msra.mxu1 (!%p4501_p5), %v5204_v6  ;;  %v3095_v8 = vrot.slane (!%p4501_p5), %v3088_v7, %v3094_v63  ;;  %v5209_v63 = vld [vmem:[%s6369_s7 + $0x148] sm:$0xff] (!%p4501_p5)  }
 0x3d2   : > { %3075 = vst [vmem:[#allocation4] sm:$0xff] %v3072_v9  ;;  %v3099_v9 = vrot.slane (!%p4501_p5), %v3088_v7, %v3098_v1  ;;  %v3173_v1 = vrot.slane (!%p4501_p5), %v3166_v58, %v6041_v60  ;;  %v5211_v6 = vld [vmem:[%s6369_s7 + $0x1c8] sm:$0xff] (!%p4501_p5)   ;;  %v5274_v58 = vmov (!%p4501_p5), 0  }
 0x407   : > { %v2928_v10 = vpop.f32.mrb[4].mxu0 }
 0x408   : > { %v2969_v11 = vpop.f32.mrb[4].mxu1  ;;  %v2930_v12 = vpop.f32.mrb[5].mxu0 }
 0x409   : > { %v2971_v13 = vpop.f32.mrb[5].mxu1  ;;  %v3044_v14 = vcombine.low %v2928_v10, %v2930_v12  ;;  %v2932_v46 = vpop.f32.mrb[6].mxu0  ;;  %v3103_v10 = vrot.slane (!%p4501_p5), %v3088_v7, %v3102_v3  ;;  %v5205_v12 = vld [vmem:[%s6369_s7 + $0x140] sm:$0xff] (!%p4501_p5)  }
 0x40a   : > { %v3045_v15 = vcombine.low %v2969_v11, %v2971_v13  ;;  %v2973_v17 = vpop.f32.mrb[6].mxu1  ;;  %v2933_v18 = vpop.f32.mrb[7].mxu0  ;;  %v3107_v11 = vrot.slane (!%p4501_p5), %v3088_v7, %v3106_v5  ;;  %v3132_v13 = vcombine.low (!%p4501_p5), %v3095_v8, %v3099_v9  ;;  %4633 = vmatprep.subr.bf16.mxu0 (!%p4501_p5), %v5205_v12  ;;  %v5210_v8 = vld [vmem:[%s6369_s7 + $0x108] sm:$0xff] (!%p4501_p5)   ;;  %v5213_v9 = vld [vmem:[%s6369_s7 + $0x150] sm:$0xff] (!%p4501_p5)  }
 0x40b   : > { %v2974_v22 = vpop.f32.mrb[7].mxu1  ;;  %v3052_v16 = vrot.slane %v3044_v14, %v6041_v60  ;;  %v3085_v18 = vld [vmem:[#allocation4] sm:$0xff] (!%p4501_p5)  ;;  %v5215_v12 = vld [vmem:[%s6369_s7 + $0x1d0] sm:$0xff] (!%p4501_p5)  }
 0x40c   : > { %v3059_v26 = vrot.slane %v3045_v15, %v6041_v60  ;;  %v3133_v14 = vcombine.low (!%p4501_p5), %v3103_v10, %v3107_v11  ;;  %v5207_v15 = vld [vmem:[%s6369_s7 + $0x1c0] sm:$0xff] (!%p4501_p5)   ;;  %v3140_v46 = vrot.slane (!%p4501_p5), %v3132_v13, %v6041_v60  ;;  %v5212_v11 = vld [vmem:[%s6369_s7 + $0x188] sm:$0xff] (!%p4501_p5)  }
 0x40d   : > { %4655 = vmatprep.subr.bf16.mxu1 (!%p4501_p5), %v5207_v15  ;;  %v5217_v15 = vld [vmem:[%s6369_s7 + $0x158] sm:$0xff] (!%p4501_p5)  }
 0x40e   : > { %v3060_v28 = vcombine.low %v3052_v16, %v3059_v26  ;;  %v3147_v17 = vrot.slane (!%p4501_p5), %v3133_v14, %v6041_v60  ;;  %v5214_v14 = vld [vmem:[%s6369_s7 + $0x110] sm:$0xff] (!%p4501_p5)  }
 0x410   : > { %v3073_v29 = vadd.f32 %v3060_v28, %v1837_v27  ;;  %v3148_v22 = vcombine.low (!%p4501_p5), %v3140_v46, %v3147_v17  ;;  %v3110_v27 = vsub.s32 (!%p4501_p5), 4, %v6038_v57  ;;  %v3114_v28 = vsub.s32 (!%p4501_p5), 5, %v6038_v57  ;;  %v5216_v46 = vld [vmem:[%s6369_s7 + $0x190] sm:$0xff] (!%p4501_p5)  }
 0x412   : > { %3076 = vst [vmem:[#allocation4 + $0x8] sm:$0xff] %v3073_v29  ;;  %v3177_v16 = vadd.f32 (!%p4501_p5), %v3148_v22, %v3085_v18  ;;  %v5219_v18 = vld [vmem:[%s6369_s7 + $0x1d8] sm:$0xff] (!%p4501_p5)  }
 0x413   : > { %v5218_v22 = vld [vmem:[%s6369_s7 + $0x118] sm:$0xff] (!%p4501_p5)  }
 0x414   : > { %v3180_v26 = vsub.f32 (!%p4501_p5), 0.0, %v3177_v16  ;;  %v3198_v35 = vmax.f32 (!%p4501_p5), %v3177_v16, 0.0 }
 0x416   : > { %v3183_v29 = vmul.f32 (!%p4501_p5), 1.442695, %v3180_v26  ;;  %v5221_v26 = vld [vmem:[%s6369_s7 + $0x160] sm:$0xff] (!%p4501_p5)  }
 0x418   : > { %5248 = vpow2.f32 (!%p4501_p5), %v3183_v29 }
 0x419   : > { %v3086_v44 = vld [vmem:[#allocation4 + $0x8] sm:$0xff] (!%p4501_p5) }
 0x422   : > { %v5249_v39 = vpop.eup (!%p4501_p5), %5248 }
 0x423   : > { %v3189_v41 = vadd.f32 (!%p4501_p5), 1.0, %v5249_v39  ;;  %v5227_v39 = vld [vmem:[%s6369_s7 + $0x1e8] sm:$0xff] (!%p4501_p5)  }
 0x425   : > { %5250 = vrcp.f32 (!%p4501_p5), %v3189_v41 }
 0x42f   : > { %v5251_v38 = vpop.eup (!%p4501_p5), %5250 }
 0x430   : > { %v3201_v48 = vmul.f32 (!%p4501_p5), %v5251_v38, %v3198_v35  ;;  %v3204_v23 = vsub.f32 (!%p4501_p5), 1.0, %v5251_v38 }
 0x432   : > { %v3207_v49 = vmul.f32 (!%p4501_p5), %v3204_v23, %v3195_v47  ;;  %v5231_v47 = vld [vmem:[%s6369_s7 + $0x1f0] sm:$0xff] (!%p4501_p5)   ;;  %v5233_v23 = vld [vmem:[%s6369_s7 + $0x178] sm:$0xff] (!%p4501_p5)  }
 0x434   : > { %v3210_v21 = vadd.f32 (!%p4501_p5), %v3207_v49, %v3201_v48  ;;  %v5232_v49 = vld [vmem:[%s6369_s7 + $0x1b0] sm:$0xff] (!%p4501_p5)  }
 0x436   : > { %v3223_v36 = vrot.slane (!%p4501_p5), %v3210_v21, %v6041_v60  ;;  %v3216_v50 = vcombine.high (!%p4501_p5), %v3210_v21, %v3210_v21 }
 0x438   : > { %v3231_v54 = vcombine.high (!%p4501_p5), %v3223_v36, %v3223_v36  ;;  %v3230_v55 = vrot.slane (!%p4501_p5), %v3216_v50, %v6041_v60  ;;  %v3268_v56 = vpack.c.bf16 (!%p4501_p5), %v3223_v36, %v3223_v36  ;;  %v5235_v36 = vld [vmem:[%s6369_s7 + $0x1f8] sm:$0xff] (!%p4501_p5)  }
 0x439   : > { %v5234_v50 = vld [vmem:[%s6369_s7 + $0x138] sm:$0xff] (!%p4501_p5)  }
 0x43a   : > { %v3269_v61 = vpack.c.bf16 (!%p4501_p5), %v3231_v54, %v3231_v54  ;;  %v3232_v2 = vcombine.high (!%p4501_p5), %v3230_v55, %v3230_v55  ;;  %v3270_v62 = vpack.c.bf16 (!%p4501_p5), %v3230_v55, %v3230_v55  ;;  %v5237_v55 = vld [vmem:[%s6369_s7 + $0x200] sm:$0xff] (!%p4501_p5)  }
 0x43c   : > { %3921 = vmatprep.mubr.bf16.mxu0 (!%p4501_p5), %v3269_v61  ;;  %v3271_v5 = vpack.c.bf16 (!%p4501_p5), %v3232_v2, %v3232_v2 }
 0x43d   : > { %3922 = vmatmul.mubr.bf16.vlgmr.msra.gmra.mrb[0].mxu0 (!%p4501_p5), %v3268_v56  ;;  %v3197_v56 = vld [vmem:[#allocation3 + $0x10] sm:$0xf] (!%p4501_p5) }
 0x43e   : > { %4634 = vmatpush3.bf16.msra.mxu0 (!%p4501_p5), %v5206_v0  ;;  %3961 = vmatprep.mubr.bf16.mxu1 (!%p4501_p5), %v3271_v5 }
 0x43f   : > { %3962 = vmatmul.mubr.bf16.vlgmr.msra.gmra.mrb[0].mxu1 (!%p4501_p5), %v3270_v62  ;;  %4635 = vmatprep.subr.bf16.mxu0 (!%p4501_p5), %v5209_v63 }
 0x440   : > { %4656 = vmatpush3.bf16.msra.mxu1 (!%p4501_p5), %v5208_v25  ;;  %v5240_v25 = vld [vmem:[%s6369_s7 + $0x218] sm:$0xff] (!%p4501_p5)  }
 0x441   : > { %4657 = vmatprep.subr.bf16.mxu1 (!%p4501_p5), %v5211_v6  ;;  %v5242_v6 = vld [vmem:[%s6369_s7 + $0x228] sm:$0xff] (!%p4501_p5)  }
 0x442   : > { %4636 = vmatpush3.bf16.msra.mxu0 (!%p4501_p5), %v5210_v8  ;;  %v5244_v8 = vld [vmem:[%s6369_s7 + $0x238] sm:$0xff] (!%p4501_p5)  }
 0x443   : > { %4637 = vmatprep.subr.bf16.mxu0 (!%p4501_p5), %v5213_v9  ;;  %v5245_v9 = vld [vmem:[%s6369_s7 + $0x240] sm:$0xff] (!%p4501_p5)  }
 0x444   : > { %4658 = vmatpush3.bf16.msra.mxu1 (!%p4501_p5), %v5212_v11  ;;  %v5247_v11 = vld [vmem:[%s6369_s7 + $0x250] sm:$0xff] (!%p4501_p5)  }
 0x445   : > { %4659 = vmatprep.subr.bf16.mxu1 (!%p4501_p5), %v5215_v12 }
 0x446   : > { %4638 = vmatpush3.bf16.msra.mxu0 (!%p4501_p5), %v5214_v14  ;;  %v4090_v14 = vld [vmem:[%s6371_s9 + $0x8] sm:$0xff] (!%p4501_p5) }
 0x447   : > { %v3010_v30 = vpop.f32.mrb[8].mxu0  ;;  %4639 = vmatprep.subr.bf16.mxu0 (!%p4501_p5), %v5217_v15  ;;  %v4091_v15 = vld [vmem:[%s6371_s9 + $0x10] sm:$0xff] (!%p4501_p5) }
 0x448   : > { %v3012_v31 = vpop.f32.mrb[9].mxu0  ;;  %4660 = vmatpush3.bf16.msra.mxu1 (!%p4501_p5), %v5216_v46  ;;  %v5275_v46 = vmov (!%p4501_p5), 0.0|0.0  }
 0x449   : > { %v3061_v32 = vcombine.low %v3010_v30, %v3012_v31  ;;  %v3014_v33 = vpop.f32.mrb[10].mxu0  ;;  %3084 = sbr.rel (%p4501_p5) target bundleno = 1625 (0x659), region = 72  ;;  %v3118_v30 = vsub.s32 (!%p4501_p5), 6, %v6038_v57  ;;  %v3122_v31 = vsub.s32 (!%p4501_p5), 7, %v6038_v57  ;;  %4661 = vmatprep.subr.bf16.mxu1 (!%p4501_p5), %v5219_v18  ;;  %v4092_v18 = vld [vmem:[%s6371_s9 + $0x18] sm:$0xff] (!%p4501_p5) }
 0x44a   : > { %v3015_v20 = vpop.f32.mrb[11].mxu0  ;;  %v3115_v33 = vrot.slane (!%p4501_p5), %v3088_v7, %v3114_v28  ;;  %v5220_v28 = vld [vmem:[%s6369_s7 + $0x198] sm:$0xff] (!%p4501_p5)   ;;  %4640 = vmatpush3.bf16.msra.mxu0 (!%p4501_p5), %v5218_v22  ;;  %v4735_v22 = vpack.c.bf16 (!%p4501_p5), %v4092_v18, %v4091_v15 }
 0x44b   : > { %v3068_v4 = vrot.slane %v3061_v32, %v6041_v60  ;;  %v3111_v32 = vrot.slane (!%p4501_p5), %v3088_v7, %v3110_v27  ;;  %v3123_v20 = vrot.slane (!%p4501_p5), %v3088_v7, %v3122_v31  ;;  %v3196_v27 = vld [vmem:[#allocation3 + $0x8] sm:$0xff] (!%p4501_p5)  ;;  %4641 = vmatprep.subr.bf16.mxu0 (!%p4501_p5), %v5221_v26  ;;  %v4094_v26 = vld [vmem:[%s6371_s9 + $0x28] sm:$0xff] (!%p4501_p5) }
 0x44c   : > { %v5223_v31 = vld [vmem:[%s6369_s7 + $0x1e0] sm:$0xff] (!%p4501_p5)   ;;  %4662 = vmatpush3.bf16.msra.mxu1 (!%p4501_p5), %v5220_v28  ;;  %v4095_v28 = vld [vmem:[%s6371_s9 + $0x30] sm:$0xff] (!%p4501_p5) }
 0x44d   : > { %v3074_v37 = vadd.f32 %v3068_v4, %v1838_v34  ;;  %v3119_v34 = vrot.slane (!%p4501_p5), %v3088_v7, %v3118_v30  ;;  %v3149_v4 = vcombine.low (!%p4501_p5), %v3111_v32, %v3115_v33  ;;  %v5222_v32 = vld [vmem:[%s6369_s7 + $0x120] sm:$0xff] (!%p4501_p5)   ;;  %4663 = vmatprep.subr.bf16.mxu1 (!%p4501_p5), %v5223_v31 }
 0x44e   : > { %4642 = vmatpush3.bf16.msra.mxu0 (!%p4501_p5), %v5222_v32  ;;  %v4097_v31 = vld [vmem:[%s6371_s9 + $0x40] sm:$0xff] (!%p4501_p5)  ;;  %v4098_v32 = vld [vmem:[%s6371_s9 + $0x48] sm:$0xff] (!%p4501_p5) }
 0x44f   : > { %3080 = vst.msk [vmem:[#allocation4 + $0x10] sm:$0xf] %vm3079_vm12, %v3074_v37  ;;  %v3150_v37 = vcombine.low (!%p4501_p5), %v3119_v34, %v3123_v20  ;;  %v3157_v24 = vrot.slane (!%p4501_p5), %v3149_v4, %v6041_v60  ;;  %v5225_v34 = vld [vmem:[%s6369_s7 + $0x168] sm:$0xff] (!%p4501_p5)   ;;  %v5224_v20 = vld [vmem:[%s6369_s7 + $0x1a0] sm:$0xff] (!%p4501_p5)  }
 0x450   : > { %4643 = vmatprep.subr.bf16.mxu0 %v5225_v34  ;;  %4664 = vmatpush3.bf16.msra.mxu1 %v5224_v20  ;;  %v4099_v34 = vld [vmem:[%s6371_s9 + $0x50] sm:$0xff]  ;;  %v4100_v20 = vld [vmem:[%s6371_s9 + $0x58] sm:$0xff] }
 0x451   : > { %v3164_v40 = vrot.slane %v3150_v37, %v6041_v60  ;;  %4665 = vmatprep.subr.bf16.mxu1 %v5227_v39  ;;  %v4101_v39 = vld [vmem:[%s6371_s9 + $0x60] sm:$0xf] }
 0x453   : > { %v3165_v42 = vcombine.low %v3157_v24, %v3164_v40  ;;  %v5226_v24 = vld [vmem:[%s6369_s7 + $0x128] sm:$0xff]  }
 0x454   : > { %4644 = vmatpush3.bf16.msra.mxu0 %v5226_v24 }
 0x455   : > { %v6170_v45 = vadd.f32 %v3165_v42, %v3086_v44  ;;  %v5229_v44 = vld [vmem:[%s6369_s7 + $0x170] sm:$0xff]  }
 0x456   : > { %v3087_v3 = vld [vmem:[#allocation4 + $0x10] sm:$0xf]  ;;  %4645 = vmatprep.subr.bf16.mxu0 %v5229_v44 }
 0x457   : > { %v3181_v19 = vsub.f32 0.0, %v6170_v45  ;;  %v6195_v7 = vadd.f32 %v3173_v1, %v3087_v3  ;;  %v3199_v17 = vmax.f32 %v6170_v45, 0.0  ;;  %v5228_v45 = vld [vmem:[%s6369_s7 + $0x1a8] sm:$0xff]  }
 0x458   : > { %4666 = vmatpush3.bf16.msra.mxu1 %v5228_v45  ;;  %v5238_v3 = vld [vmem:[%s6369_s7 + $0x208] sm:$0xff]  }
 0x459   : > { %v3185_v43 = vmul.f32 1.442695, %v3181_v19  ;;  %v3182_v10 = vsub.f32 0.0, %v6195_v7  ;;  %4667 = vmatprep.subr.bf16.mxu1 %v5231_v47  ;;  %v3200_v51 = vmax.f32 %v6195_v7, 0.0  ;;  %v5243_v7 = vld [vmem:[%s6369_s7 + $0x230] sm:$0xff]  }
 0x45b   : > { %5252 = vpow2.f32 %v3185_v43  ;;  %v3187_v13 = vmul.f32 1.442695, %v3182_v10  ;;  %v5230_v43 = vld [vmem:[%s6369_s7 + $0x130] sm:$0xff]   ;;  %v5246_v10 = vld [vmem:[%s6369_s7 + $0x248] sm:$0xff]  }
 0x45c   : > { %4646 = vmatpush3.bf16.msra.mxu0 %v5230_v43  ;;  %4668 = vmatpush3.bf16.msra.mxu1 %v5232_v49 }
 0x45d   : > { %4647 = vmatprep.subr.bf16.mxu0 %v5233_v23  ;;  %4669 = vmatprep.subr.bf16.mxu1 %v5235_v36 }
 0x460   : > { %4648 = vmatpush3.bf16.msra.mxu0 %v5234_v50  ;;  %4670 = vmatpush3.bf16.msra.mxu1 %v5236_v52 }
 0x461   : > { %4049 = vmatprep.subr.bf16.mxu0 %v5274_v58  ;;  %4731 = vmatprep.subr.bf16.mxu1 %v5275_v46 }
 0x465   : > { %v5253_v59 = vpop.eup %5252 }
 0x466   : > { %v3190_v57 = vadd.f32 1.0, %v5253_v59 }
 0x468   : > { %5254 = vrcp.f32 %v3190_v57  ;;  %v5239_v57 = vld [vmem:[%s6369_s7 + $0x210] sm:$0xff]  }
 0x469   : > { %5256 = vpow2.f32 %v3187_v13  ;;  %v4089_v13 = vld [vmem:[%s6371_s9] sm:$0xff] }
 0x472   : > { %v5255_v16 = vpop.eup %5254 }
 0x473   : > { %v3202_v29 = vmul.f32 %v5255_v16, %v3199_v17  ;;  %v3205_v30 = vsub.f32 1.0, %v5255_v16  ;;  %v5257_v37 = vpop.eup %5256  ;;  %v4732_v17 = vpack.c.bf16 %v4090_v14, %v4089_v13  ;;  %v4093_v16 = vld [vmem:[%s6371_s9 + $0x20] sm:$0xff] }
 0x474   : > { %v3191_v42 = vadd.f32 1.0, %v5257_v37  ;;  %v5276_v37 = vmov 0.0  }
 0x475   : > { %v3208_v33 = vmul.f32 %v3205_v30, %v3196_v27  ;;  %v4738_v27 = vpack.c.bf16 %v4094_v26, %v4093_v16 }
 0x476   : > { %5258 = vrcp.f32 %v3191_v42 }
 0x477   : > { %v3211_v4 = vadd.f32 %v3208_v33, %v3202_v29  ;;  %v4096_v29 = vld [vmem:[%s6371_s9 + $0x38] sm:$0xff]  ;;  %v4744_v33 = vpack.c.bf16 %v4098_v32, %v4097_v31 }
 0x478   : > { %v4741_v30 = vpack.c.bf16 %v4096_v29, %v4095_v28 }
 0x479   : > { %v3240_v40 = vrot.slane %v3211_v4, %v6041_v60  ;;  %v3233_v41 = vcombine.high %v3211_v4, %v3211_v4  ;;  %v4747_v4 = vpack.c.bf16 %v4100_v20, %v4099_v34 }
 0x47b   : > { %v3248_v35 = vcombine.high %v3240_v40, %v3240_v40  ;;  %v3247_v19 = vrot.slane %v3233_v41, %v6041_v60  ;;  %v3272_v53 = vpack.c.bf16 %v3240_v40, %v3240_v40  ;;  %v4502_v40 = vld [vmem:[%s6370_s8] ss:$0 sm:$0xff] }
 0x47d   : > { %v3273_v38 = vpack.c.bf16 %v3248_v35, %v3248_v35  ;;  %v3249_v48 = vcombine.high %v3247_v19, %v3247_v19  ;;  %v3274_v59 = vpack.c.bf16 %v3247_v19, %v3247_v19 }
 0x47f   : > { %4001 = vmatprep.mubr.bf16.mxu0 %v3273_v38  ;;  %v3275_v21 = vpack.c.bf16 %v3249_v48, %v3249_v48 }
 0x480   : > { %v5259_v54 = vpop.eup %5258  ;;  %4002 = vmatmul.mubr.bf16.vlgmr.msra.gmra.mrb[4].mxu0 %v3272_v53 }
 0x481   : > { %4041 = vmatprep.mubr.bf16.mxu1 %v3275_v21  ;;  %v3203_v61 = vmul.f32 %v5259_v54, %v3200_v51  ;;  %v3206_v0 = vsub.f32 1.0, %v5259_v54  ;;  %4050 = vmatpush1.bf16.msra.mxu0 %v5237_v55 }
 0x482   : > { %4042 = vmatmul.mubr.bf16.vlgmr.msra.gmra.mrb[4].mxu1 %v3274_v59  ;;  %4051 = vmatprep.subr.bf16.mxu0 %v5274_v58 }
 0x483   : > { %v3209_v2 = vmul.f32 %v3206_v0, %v3197_v56  ;;  %4733 = vmatpush3.bf16.msra.mxu1 %v4732_v17  ;;  %4724 = vmatprep.mubr.msk.f32.mxu1 %vm5277_vm15, %v5276_v37 }
 0x484   : > { %4734 = vmatprep.subr.bf16.mxu1 %v5275_v46 }
 0x485   : > { %v3212_v62 = vadd.f32 %v3209_v2, %v3203_v61  ;;  %4052 = vmatpush1.bf16.msra.mxu0 %v5238_v3 }
 0x486   : > { %4053 = vmatprep.subr.bf16.mxu0 %v5274_v58 }
 0x487   : > { %v3256_v63 = vrot.slane %v3212_v62, %v6041_v60  ;;  %v5241_v60 = vld [vmem:[%s6369_s7 + $0x220] sm:$0xff]   ;;  %4736 = vmatpush3.bf16.msra.mxu1 %v4735_v22 }
 0x488   : > { %4737 = vmatprep.subr.bf16.mxu1 %v5275_v46 }
 0x489   : > { %v3257_v1 = vcombine.high %v3256_v63, %v3256_v63  ;;  %4054 = vmatpush1.bf16.msra.mxu0 %v5239_v57  ;;  %v3276_v12 = vpack.c.bf16 %v3256_v63, %v3256_v63  ;;  %v4579_v63 = vld [vmem:[#allocation5] ss:$0 sm:$0xff] }
 0x48a   : > { %4055 = vmatprep.subr.bf16.mxu0 %v5274_v58 }
 0x48b   : > { %v3277_v5 = vpack.c.bf16 %v3257_v1, %v3257_v1  ;;  %4739 = vmatpush3.bf16.msra.mxu1 %v4738_v27 }
 0x48c   : > { %4740 = vmatprep.subr.bf16.mxu1 %v5275_v46 }
 0x48d   : > { %4578 = vmatprep.mubr.msk.bf16.mxu0 %vm3885_vm13, %v3277_v5  ;;  %4056 = vmatpush1.bf16.msra.mxu0 %v5240_v25 }
 0x48e   : > { %4057 = vmatprep.subr.bf16.mxu0 %v5274_v58 }
 0x48f   : > { %4742 = vmatpush3.bf16.msra.mxu1 %v4741_v30 }
 0x490   : > { %4743 = vmatprep.subr.bf16.mxu1 %v5275_v46 }
 0x491   : > { %4058 = vmatpush1.bf16.msra.mxu0 %v5241_v60 }
 0x492   : > { %4059 = vmatprep.subr.bf16.mxu0 %v5274_v58 }
 0x493   : > { %4745 = vmatpush3.bf16.msra.mxu1 %v4744_v33 }
 0x494   : > { %4746 = vmatprep.subr.bf16.mxu1 %v5275_v46 }
 0x495   : > { %4060 = vmatpush1.bf16.msra.mxu0 %v5242_v6 }
 0x496   : > { %4061 = vmatprep.subr.bf16.mxu0 %v5274_v58 }
 0x497   : > { %4748 = vmatpush3.bf16.msra.mxu1 %v4747_v4 }
 0x498   : > { %4722 = vmatprep.subr.mxu1 %v5276_v37 }
 0x499   : > { %4062 = vmatpush1.bf16.msra.mxu0 %v5243_v7 }
 0x49a   : > { %4063 = vmatprep.subr.bf16.mxu0 %v5274_v58 }
 0x49b   : > { %4723 = vmatpush3.msk.msra.mxu1 %vm4113_vm14, %v4101_v39 }
 0x49d   : > { %4064 = vmatpush1.bf16.msra.mxu0 %v5244_v8 }
 0x49e   : > { %4065 = vmatprep.subr.bf16.mxu0 %v5274_v58 }
 0x4a1   : > { %4066 = vmatpush1.bf16.msra.mxu0 %v5245_v9 }
 0x4a2   : > { %4067 = vmatprep.subr.bf16.mxu0 %v5274_v58 }
 0x4a5   : > { %4068 = vmatpush1.bf16.msra.mxu0 %v5246_v10 }
 0x4a6   : > { %4069 = vmatprep.subr.bf16.mxu0 %v5274_v58 }
 0x4a9   : > { %4070 = vmatpush1.bf16.msra.mxu0 %v5247_v11 }
 0x4ac   : > { %4082 = vmatmul.mubr.bf16.vlgmr.msra.gmra.mrb[8].mxu0 %v3276_v12 }
 0x510   : > { %v4605_v24 = vpop.f32.mrb[0].mxu0 }
 0x511   : > { %v4606_v41 = vpop.f32.mrb[1].mxu0 }
 0x512   : > { %v4607_v42 = vadd.f32 %v4606_v41, %v4605_v24  ;;  %v4608_v44 = vpop.f32.mrb[2].mxu0  ;;  %v4627_v45 = vpop.f32.mrb[0].mxu1 }
 0x513   : > { %v4609_v35 = vpop.f32.mrb[3].mxu0  ;;  %v4628_v19 = vpop.f32.mrb[1].mxu1 }
 0x514   : > { %v3924_v47 = vadd.f32 %v4607_v42, %v4502_v40  ;;  %v4629_v43 = vadd.f32 %v4628_v19, %v4627_v45  ;;  %v4630_v38 = vpop.f32.mrb[2].mxu1 }
 0x515   : > { %v4631_v48 = vpop.f32.mrb[3].mxu1 }
 0x516   : > { %v3964_v23 = vadd.f32 %v4629_v43, %v3924_v47 }
 0x553   : > { %v4649_v49 = vpop.f32.mrb[4].mxu0 }
 0x554   : > { %v4650_v21 = vpop.f32.mrb[5].mxu0 }
 0x555   : > { %v4651_v36 = vadd.f32 %v4650_v21, %v4649_v49  ;;  %v4652_v50 = vpop.f32.mrb[6].mxu0  ;;  %v4671_v51 = vpop.f32.mrb[4].mxu1 }
 0x556   : > { %v4653_v52 = vpop.f32.mrb[7].mxu0  ;;  %v4672_v53 = vpop.f32.mrb[5].mxu1 }
 0x557   : > { %v4004_v54 = vadd.f32 %v4651_v36, %v3964_v23  ;;  %v4673_v55 = vadd.f32 %v4672_v53, %v4671_v51  ;;  %v4674_v56 = vpop.f32.mrb[6].mxu1 }
 0x558   : > { %v4675_v58 = vpop.f32.mrb[7].mxu1 }
 0x559   : > { %v4044_v59 = vadd.f32 %v4673_v55, %v4004_v54 }
 0x57f   : > { %v4083_v61 = vpop.f32.mrb[8].mxu0 }
 0x580   : > { %v4084_v0 = vadd.f32 %v4083_v61, %v4044_v59  ;;  %v4085_v2 = vpop.f32.mrb[9].mxu0 }
 0x581   : > { %v4086_v3 = vpop.f32.mrb[10].mxu0 }
 0x582   : > { %v4087_v62 = vpop.f32.mrb[11].mxu0  ;;  %4725 = vmatmul.mubr.msk.f32.vlgmr.msra.gmra.mrb[8].mxu1 %vm4109_vm0, %v4084_v0 }
 0x655   : > { %v4183_v57 = vpop.f32.mrb[8].mxu1 }
 0x656   : > { %v4184_v1 = vadd.f32 %v4579_v63, %v4183_v57  ;;  %v4726_v5 = vpop.f32.mrb[9].mxu1 }
 0x658   : > { %4188 = vst.msk [vmem:[%s6373_s11] sm:$0x3] %vm4187_vm1, %v4184_v1 }
 0x659 PF: > { %s23_s19 = sadd.s32 1, %s5266_s19  }
 0x65a   : > { %p20_p6 = scmp.ge.s32.totalorder %s23_s19, 7  }
 0x65c   :  { %22 = sbr.rel (!%p20_p6) target bundleno = 3 (0x3), region = 103 }

</bundles_post_ra>
